<compile_context>
chip_gen: v7x
topology: tpu7x:2x2x1
jax: 0.10.0
libtpu: 0.0.40
codegen_flags: <defaults>
</compile_context>

<pallas_src>
import functools
import math

import jax
import jax.numpy as jnp
from jax.experimental import pallas as pl
from jax.experimental.pallas import tpu as pltpu

# Small synthetic sizes (stand-in for d_model=768 / 12-layer BERT).
B = 2      # batch of text lists
L = 4      # templates per batch entry
S = 8      # tokens per template
D = 32     # hidden size (d_model)
DFF = 128  # FFN inner size (4 * D)
VOCAB = 64


def _layernorm(h, gamma, beta, eps=1e-12):
    mu = jnp.mean(h, axis=-1, keepdims=True)
    var = jnp.mean((h - mu) ** 2, axis=-1, keepdims=True)
    return (h - mu) * jax.lax.rsqrt(var + eps) * gamma + beta


def log_encoder_kernel(
    x_ref,       # (M, D)      f32  flattened embedded tokens, M = B*L*S
    wqkv_ref,    # (3, D, D)   bf16 stacked Q/K/V weights (scale folded in Q)
    wo_ref,      # (D, D)      bf16
    w1_ref,      # (D, DFF)    bf16
    w2_ref,      # (DFF, D)    bf16
    vec_ref,     # (16, 128)   f32  packed biases / layernorm params
    eye_ref,     # (D, L*D)    f32  [I I I I] identity tiling (widen h2)
    mask_ref,    # (M, L*D)    f32  per-token template lane mask
    pool_ref,    # (B, M)      f32  batch-selection * 1/S pooling matrix
    out_ref,     # (B, L*D)    f32  lane-dense pooled encodings
    *, b, l, s, d, dff,
):
    m = b * l * s
    bl = b * l

    x = x_ref[...].astype(jnp.float32)            # (M, D)
    x_bf = x.astype(jnp.bfloat16)

    # --- unpack the single bias / LN slab (one DMA for 10 tiny vectors) ---
    slab = vec_ref[...]
    bq = slab[0:1, :d]        # 1/sqrt(d) already folded in (pack_params)
    bk = slab[1:2, :d]
    bv = slab[2:3, :d]
    bo = slab[3:4, :d]
    g1 = slab[4:5, :d]
    be1 = slab[5:6, :d]
    b1 = slab[6:7, :dff]
    b2 = slab[7:8, :d]
    g2 = slab[8:9, :d]
    be2 = slab[9:10, :d]

    # --- Q/K/V projections: three (M,D)x(D,D) MXU matmuls, bf16 in / f32 acc.
    # (Separate matmuls avoid lane-internal slices at this synthetic D=32.)
    q = (jnp.dot(x_bf, wqkv_ref[0], preferred_element_type=jnp.float32)
         + bq).reshape(bl, s, d)
    k = (jnp.dot(x_bf, wqkv_ref[1], preferred_element_type=jnp.float32)
         + bk).reshape(bl, s, d)
    v = (jnp.dot(x_bf, wqkv_ref[2], preferred_element_type=jnp.float32)
         + bv).reshape(bl, s, d)

    # --- per-template single-head self-attention ---
    # TODO(synk): no attention / padding mask -- the real tokenizer pads
    # variable-length templates; here all S tokens are valid by construction.
    scores = jnp.einsum("lqd,lkd->lqk",
                        q.astype(jnp.bfloat16), k.astype(jnp.bfloat16),
                        preferred_element_type=jnp.float32)
    scores = scores - jnp.max(scores, axis=-1, keepdims=True)
    p = jnp.exp(scores)
    p = p * pl.reciprocal(jnp.sum(p, axis=-1, keepdims=True), approx=True)
    attn = jnp.einsum("lqk,lkd->lqd",
                      p.astype(jnp.bfloat16), v.astype(jnp.bfloat16),
                      preferred_element_type=jnp.float32).reshape(m, d)

    attn = jnp.dot(attn.astype(jnp.bfloat16), wo_ref[...],
                   preferred_element_type=jnp.float32) + bo
    h = _layernorm(x + attn, g1, be1)

    # --- feed-forward (flattened M dimension, single MXU matmul each) ---
    f = jnp.dot(h.astype(jnp.bfloat16), w1_ref[...],
                preferred_element_type=jnp.float32) + b1
    # TODO(synk): pretrained BERT uses exact erf GELU; tanh approximation used
    # here (matches the in-file reference) to keep the Mosaic lowering simple.
    f = jax.nn.gelu(f, approximate=True)
    f = jnp.dot(f.astype(jnp.bfloat16), w2_ref[...],
                preferred_element_type=jnp.float32) + b2
    h2 = _layernorm(h + f, g2, be2)

    # --- mean pool over tokens (torch.mean(te, dim=1)), done on the MXU and
    # stored lane-dense: widen h2 to (M, L*D), keep only each token's own
    # template block, then one (B,M)x(M,L*D) matmul with 1/S pooling weights.
    # TODO(synk): unmasked mean; real padded tokens need a masked mean.
    h2_wide = jnp.dot(h2, eye_ref[...],
                      preferred_element_type=jnp.float32) * mask_ref[...]
    out_ref[...] = jnp.dot(pool_ref[...], h2_wide,
                           preferred_element_type=jnp.float32
                           ).astype(out_ref.dtype)


def pack_params(raw, d=D, dff=DFF):
    """Fold the attention scale into Wq/bq, cast weights to bf16, stack QKV
    along a leading axis, and pack all small vectors into one (16,128) slab."""
    (wq, bq, wk, bk, wv, bv, wo, bo, g1, be1, w1, b1, w2, b2, g2, be2) = raw
    inv_sqrt_d = 1.0 / math.sqrt(d)
    wq = wq * inv_sqrt_d
    bq = bq * inv_sqrt_d

    wqkv = jnp.stack([wq, wk, wv], axis=0).astype(jnp.bfloat16)   # (3, D, D)

    row_w = max(dff, d)

    def row(vec):
        return jnp.pad(vec, ((0, 0), (0, row_w - vec.shape[1])))

    rows = [bq, bk, bv, bo, g1, be1, b1, b2, g2, be2]
    slab = jnp.concatenate([row(v) for v in rows], axis=0)        # (10, 128)
    slab = jnp.pad(slab, ((0, 16 - slab.shape[0]), (0, 0)))       # (16, 128)

    return (wqkv, wo.astype(jnp.bfloat16), w1.astype(jnp.bfloat16),
            w2.astype(jnp.bfloat16), slab)


def log_encoder(x_emb, packed_params):
    """x_emb: (B, L, S, D) float32 -> (B, L, D) float32."""
    b, l, s, d = x_emb.shape
    wqkv, wo, w1, w2, vec_slab = packed_params
    dff = w1.shape[1]
    bl = b * l
    m = bl * s
    ld = l * d

    x_flat = x_emb.reshape(m, d).astype(jnp.float32)

    # Constant pooling operands (fold into the MXU instead of XLU reduces):
    tok = jnp.arange(m, dtype=jnp.int32)
    pool_b = ((tok[None, :] // (l * s))
              == jnp.arange(b, dtype=jnp.int32)[:, None]
              ).astype(jnp.float32) / s                           # (B, M)
    tok_tmpl = (tok // s) % l                                     # (M,)
    lane_tmpl = jnp.arange(ld, dtype=jnp.int32) // d              # (L*D,)
    tmpl_mask = (tok_tmpl[:, None] == lane_tmpl[None, :]
                 ).astype(jnp.float32)                            # (M, L*D)
    eye_tile = jnp.tile(jnp.eye(d, dtype=jnp.float32), (1, l))    # (D, L*D)

    flops = (
        3 * 2 * m * d * d            # Q/K/V projections
        + 2 * bl * s * s * d * 2     # scores + attn @ V
        + 2 * m * d * d              # output projection
        + 2 * m * d * dff * 2        # FFN
        + 2 * m * d * ld             # widen h2 to (M, L*D)
        + 2 * b * m * ld             # pooling matmul
    )
    transcendentals = bl * s * s + m * dff + 2 * m + bl * s
    bytes_accessed = (
        4 * x_flat.size
        + 2 * (wqkv.size + wo.size + w1.size + w2.size)           # bf16
        + 4 * (vec_slab.size + eye_tile.size + tmpl_mask.size + pool_b.size)
        + 4 * b * ld
    )

    kernel = functools.partial(log_encoder_kernel, b=b, l=l, s=s, d=d, dff=dff)
    vmem = lambda: pl.BlockSpec(memory_space=pltpu.MemorySpace.VMEM)

    out = pl.pallas_call(
        kernel,
        out_shape=jax.ShapeDtypeStruct((b, ld), jnp.float32),
        in_specs=[vmem() for _ in range(9)],
        out_specs=vmem(),
        compiler_params=pltpu.CompilerParams(
            vmem_limit_bytes=32 * 1024 * 1024),
        cost_estimate=pl.CostEstimate(
            flops=int(flops),
            transcendentals=int(transcendentals),
            bytes_accessed=int(bytes_accessed)),
    )(x_flat, wqkv, wo, w1, w2, vec_slab, eye_tile, tmpl_mask, pool_b)

    return out.reshape(b, l, d)


def _reference(x_emb, raw_params):
    """Pure-JAX reference of the same single-layer encoder + mean pool.
    Mirrors the kernel's declared mixed precision (bf16 operands at every
    matmul, f32 accumulation/elementwise) so the check stays tight."""
    (wq, bq, wk, bk, wv, bv, wo, bo, g1, be1, w1, b1, w2, b2, g2, be2) = raw_params
    bf = jnp.bfloat16
    x = x_emb.astype(jnp.float32)

    def lin(t, w, bias):
        return jnp.einsum("bls d,de->bls e".replace(" ", ""), t.astype(bf),
                          w.astype(bf),
                          preferred_element_type=jnp.float32) + bias

    q, k, v = lin(x, wq, bq), lin(x, wk, bk), lin(x, wv, bv)
    sc = jnp.einsum("blqd,blkd->blqk", q.astype(bf), k.astype(bf),
                    preferred_element_type=jnp.float32) / math.sqrt(D)
    p = jax.nn.softmax(sc, axis=-1)
    attn = jnp.einsum("blqk,blkd->blqd", p.astype(bf), v.astype(bf),
                      preferred_element_type=jnp.float32)
    attn = lin(attn, wo, bo)
    h = _layernorm(x + attn, g1, be1)
    f = lin(h, w1, b1)
    f = jax.nn.gelu(f, approximate=True)
    f = lin(f, w2, b2)
    h2 = _layernorm(h + f, g2, be2)
    return jnp.mean(h2, axis=2)


def make_params(key):
    ks = jax.random.split(key, 16)
    scale = 0.05
    n = lambda k, shp: scale * jax.random.normal(k, shp, jnp.float32)
    wq = n(ks[0], (D, D))
    wk = n(ks[1], (D, D))
    wv = n(ks[2], (D, D))
    wo = n(ks[3], (D, D))
    w1 = n(ks[4], (D, DFF))
    w2 = n(ks[5], (DFF, D))
    bq = n(ks[6], (1, D))
    bk = n(ks[7], (1, D))
    bv = n(ks[8], (1, D))
    bo = n(ks[9], (1, D))
    b1 = n(ks[10], (1, DFF))
    b2 = n(ks[11], (1, D))
    g1 = 1.0 + n(ks[12], (1, D))
    be1 = n(ks[13], (1, D))
    g2 = 1.0 + n(ks[14], (1, D))
    be2 = n(ks[15], (1, D))
    return (wq, bq, wk, bk, wv, bv, wo, bo, g1, be1, w1, b1, w2, b2, g2, be2)


if __name__ == "__main__":
    key = jax.random.PRNGKey(0)
    k_tok, k_emb, k_pos, k_par = jax.random.split(key, 4)

    # Synthetic "tokenized" log templates.
    # TODO(synk): BertTokenizer / pretrained checkpoint / dict memoization of
    # template embeddings have no Pallas equivalent; token ids + deterministic
    # weights stand in for them, and one encoder layer stands in for 12.
    token_ids = jax.random.randint(k_tok, (B, L, S), 0, VOCAB, dtype=jnp.int32)

    emb_table = 0.1 * jax.random.normal(k_emb, (VOCAB, D), jnp.float32)
    pos_emb = 0.02 * jax.random.normal(k_pos, (S, D), jnp.float32)
    x_emb = emb_table[token_ids] + pos_emb[None, None, :, :]   # (B, L, S, D)

    raw_params = make_params(k_par)
    packed_params = pack_params(raw_params)

    out = jax.block_until_ready(log_encoder(x_emb, packed_params))
    ref = _reference(x_emb, raw_params)

    assert out.shape == (B, L, D)
    max_err = float(jnp.max(jnp.abs(out - ref)))
    # tolerance covers pl.reciprocal(approx=True) + MXU vs XLA reduction order
    assert max_err < 5e-3, max_err
    print("KERNEL_OK")
</pallas_src>

<mosaic_0001>
module attributes {stable_mosaic.version = 11 : i64} {
  func.func @log_encoder_kernel(%arg0: memref<64x32xf32, #tpu.memory_space<vmem>>, %arg1: memref<3x32x32xbf16, #tpu.memory_space<vmem>>, %arg2: memref<32x32xbf16, #tpu.memory_space<vmem>>, %arg3: memref<32x128xbf16, #tpu.memory_space<vmem>>, %arg4: memref<128x32xbf16, #tpu.memory_space<vmem>>, %arg5: memref<16x128xf32, #tpu.memory_space<vmem>>, %arg6: memref<32x128xf32, #tpu.memory_space<vmem>>, %arg7: memref<64x128xf32, #tpu.memory_space<vmem>>, %arg8: memref<2x64xf32, #tpu.memory_space<vmem>>, %arg9: memref<2x128xf32, #tpu.memory_space<vmem>>) attributes {dimension_semantics = [], scalar_prefetch = 0 : i64, scratch_operands = 0 : i64, tpu.core_type = #tpu.core_type<tc>} {
    %c0 = arith.constant 0 : index
    %c0_0 = arith.constant 0 : index
    %0 = vector.load %arg0[%c0, %c0_0] : memref<64x32xf32, #tpu.memory_space<vmem>>, vector<64x32xf32>
    %1 = arith.truncf %0 : vector<64x32xf32> to vector<64x32xbf16>
    %c0_1 = arith.constant 0 : index
    %c0_2 = arith.constant 0 : index
    %2 = vector.load %arg5[%c0_1, %c0_2] : memref<16x128xf32, #tpu.memory_space<vmem>>, vector<16x128xf32>
    %3 = vector.extract_strided_slice %2 {offsets = [0, 0], sizes = [1, 32], strides = [1, 1]} : vector<16x128xf32> to vector<1x32xf32>
    %4 = vector.extract_strided_slice %2 {offsets = [1, 0], sizes = [1, 32], strides = [1, 1]} : vector<16x128xf32> to vector<1x32xf32>
    %5 = vector.extract_strided_slice %2 {offsets = [2, 0], sizes = [1, 32], strides = [1, 1]} : vector<16x128xf32> to vector<1x32xf32>
    %6 = vector.extract_strided_slice %2 {offsets = [3, 0], sizes = [1, 32], strides = [1, 1]} : vector<16x128xf32> to vector<1x32xf32>
    %7 = vector.extract_strided_slice %2 {offsets = [4, 0], sizes = [1, 32], strides = [1, 1]} : vector<16x128xf32> to vector<1x32xf32>
    %8 = vector.extract_strided_slice %2 {offsets = [5, 0], sizes = [1, 32], strides = [1, 1]} : vector<16x128xf32> to vector<1x32xf32>
    %9 = vector.extract_strided_slice %2 {offsets = [6, 0], sizes = [1, 128], strides = [1, 1]} : vector<16x128xf32> to vector<1x128xf32>
    %10 = vector.extract_strided_slice %2 {offsets = [7, 0], sizes = [1, 32], strides = [1, 1]} : vector<16x128xf32> to vector<1x32xf32>
    %11 = vector.extract_strided_slice %2 {offsets = [8, 0], sizes = [1, 32], strides = [1, 1]} : vector<16x128xf32> to vector<1x32xf32>
    %12 = vector.extract_strided_slice %2 {offsets = [9, 0], sizes = [1, 32], strides = [1, 1]} : vector<16x128xf32> to vector<1x32xf32>
    %c0_3 = arith.constant 0 : index
    %c0_4 = arith.constant 0 : index
    %c0_5 = arith.constant 0 : index
    %13 = vector.load %arg1[%c0_3, %c0_4, %c0_5] : memref<3x32x32xbf16, #tpu.memory_space<vmem>>, vector<1x32x32xbf16>
    %14 = vector.shape_cast %13 : vector<1x32x32xbf16> to vector<32x32xbf16>
    %cst = arith.constant dense<0.000000e+00> : vector<64x32xf32>
    %15 = tpu.matmul %1, %14, %cst {dimension_numbers = #tpu.dot_dimension_numbers<[1], [0], [0], [1], [0, 0, 1, 1], [], []>} : vector<64x32xbf16>, vector<32x32xbf16>, vector<64x32xf32> -> vector<64x32xf32>
    %16 = vector.broadcast %3 : vector<1x32xf32> to vector<64x32xf32>
    %17 = arith.addf %15, %16 : vector<64x32xf32>
    %18 = vector.shape_cast %17 : vector<64x32xf32> to vector<8x8x32xf32>
    %c1 = arith.constant 1 : index
    %c0_6 = arith.constant 0 : index
    %c0_7 = arith.constant 0 : index
    %19 = vector.load %arg1[%c1, %c0_6, %c0_7] : memref<3x32x32xbf16, #tpu.memory_space<vmem>>, vector<1x32x32xbf16>
    %20 = vector.shape_cast %19 : vector<1x32x32xbf16> to vector<32x32xbf16>
    %cst_8 = arith.constant dense<0.000000e+00> : vector<64x32xf32>
    %21 = tpu.matmul %1, %20, %cst_8 {dimension_numbers = #tpu.dot_dimension_numbers<[1], [0], [0], [1], [0, 0, 1, 1], [], []>} : vector<64x32xbf16>, vector<32x32xbf16>, vector<64x32xf32> -> vector<64x32xf32>
    %22 = vector.broadcast %4 : vector<1x32xf32> to vector<64x32xf32>
    %23 = arith.addf %21, %22 : vector<64x32xf32>
    %24 = vector.shape_cast %23 : vector<64x32xf32> to vector<8x8x32xf32>
    %c2 = arith.constant 2 : index
    %c0_9 = arith.constant 0 : index
    %c0_10 = arith.constant 0 : index
    %25 = vector.load %arg1[%c2, %c0_9, %c0_10] : memref<3x32x32xbf16, #tpu.memory_space<vmem>>, vector<1x32x32xbf16>
    %26 = vector.shape_cast %25 : vector<1x32x32xbf16> to vector<32x32xbf16>
    %cst_11 = arith.constant dense<0.000000e+00> : vector<64x32xf32>
    %27 = tpu.matmul %1, %26, %cst_11 {dimension_numbers = #tpu.dot_dimension_numbers<[1], [0], [0], [1], [0, 0, 1, 1], [], []>} : vector<64x32xbf16>, vector<32x32xbf16>, vector<64x32xf32> -> vector<64x32xf32>
    %28 = vector.broadcast %5 : vector<1x32xf32> to vector<64x32xf32>
    %29 = arith.addf %27, %28 : vector<64x32xf32>
    %30 = vector.shape_cast %29 : vector<64x32xf32> to vector<8x8x32xf32>
    %31 = arith.truncf %18 : vector<8x8x32xf32> to vector<8x8x32xbf16>
    %32 = arith.truncf %24 : vector<8x8x32xf32> to vector<8x8x32xbf16>
    "tpu.trace_start"() <{level = 10 : i32, message = "lqd,lkd->lqk"}> : () -> ()
    %cst_12 = arith.constant dense<0.000000e+00> : vector<8x8x8xf32>
    %33 = tpu.matmul %31, %32, %cst_12 {dimension_numbers = #tpu.dot_dimension_numbers<[2], [2], [1], [1], [0, 0, 0, 1, 1, 1], [0], [0]>} : vector<8x8x32xbf16>, vector<8x8x32xbf16>, vector<8x8x8xf32> -> vector<8x8x8xf32>
    "tpu.trace_stop"() : () -> ()
    %cst_13 = arith.constant dense<0xFF800000> : vector<8x8xf32>
    %34 = vector.multi_reduction <maximumf>, %33, %cst_13 [2] : vector<8x8x8xf32> to vector<8x8xf32>
    %35 = vector.shape_cast %34 : vector<8x8xf32> to vector<8x8x1xf32>
    %36 = vector.broadcast %35 : vector<8x8x1xf32> to vector<8x8x8xf32>
    %37 = arith.subf %33, %36 : vector<8x8x8xf32>
    %38 = math.exp %37 : vector<8x8x8xf32>
    %cst_14 = arith.constant dense<0.000000e+00> : vector<8x8xf32>
    %39 = vector.multi_reduction <add>, %38, %cst_14 [2] : vector<8x8x8xf32> to vector<8x8xf32>
    %40 = vector.shape_cast %39 : vector<8x8xf32> to vector<8x8x1xf32>
    %41 = tpu.reciprocal %40 {approx = true} : vector<8x8x1xf32> -> vector<8x8x1xf32>
    %42 = vector.broadcast %41 : vector<8x8x1xf32> to vector<8x8x8xf32>
    %43 = arith.mulf %38, %42 : vector<8x8x8xf32>
    %44 = arith.truncf %43 : vector<8x8x8xf32> to vector<8x8x8xbf16>
    %45 = arith.truncf %30 : vector<8x8x32xf32> to vector<8x8x32xbf16>
    "tpu.trace_start"() <{level = 10 : i32, message = "lqk,lkd->lqd"}> : () -> ()
    %cst_15 = arith.constant dense<0.000000e+00> : vector<8x8x32xf32>
    %46 = tpu.matmul %44, %45, %cst_15 {dimension_numbers = #tpu.dot_dimension_numbers<[2], [1], [1], [2], [0, 0, 0, 1, 1, 2], [0], [0]>} : vector<8x8x8xbf16>, vector<8x8x32xbf16>, vector<8x8x32xf32> -> vector<8x8x32xf32>
    "tpu.trace_stop"() : () -> ()
    %47 = vector.shape_cast %46 : vector<8x8x32xf32> to vector<64x32xf32>
    %48 = arith.truncf %47 : vector<64x32xf32> to vector<64x32xbf16>
    %c0_16 = arith.constant 0 : index
    %c0_17 = arith.constant 0 : index
    %49 = vector.load %arg2[%c0_16, %c0_17] : memref<32x32xbf16, #tpu.memory_space<vmem>>, vector<32x32xbf16>
    %cst_18 = arith.constant dense<0.000000e+00> : vector<64x32xf32>
    %50 = tpu.matmul %48, %49, %cst_18 {dimension_numbers = #tpu.dot_dimension_numbers<[1], [0], [0], [1], [0, 0, 1, 1], [], []>} : vector<64x32xbf16>, vector<32x32xbf16>, vector<64x32xf32> -> vector<64x32xf32>
    %51 = vector.broadcast %6 : vector<1x32xf32> to vector<64x32xf32>
    %52 = arith.addf %50, %51 : vector<64x32xf32>
    %53 = arith.addf %0, %52 : vector<64x32xf32>
    %cst_19 = arith.constant dense<0.000000e+00> : vector<64xf32>
    %54 = vector.multi_reduction <add>, %53, %cst_19 [1] : vector<64x32xf32> to vector<64xf32>
    %55 = vector.shape_cast %54 : vector<64xf32> to vector<64x1xf32>
    %cst_20 = arith.constant 3.200000e+01 : f32
    %56 = vector.broadcast %cst_20 : f32 to vector<64x1xf32>
    %57 = arith.divf %55, %56 : vector<64x1xf32>
    %58 = vector.broadcast %57 : vector<64x1xf32> to vector<64x32xf32>
    %59 = arith.subf %53, %58 : vector<64x32xf32>
    %60 = arith.mulf %59, %59 : vector<64x32xf32>
    %cst_21 = arith.constant dense<0.000000e+00> : vector<64xf32>
    %61 = vector.multi_reduction <add>, %60, %cst_21 [1] : vector<64x32xf32> to vector<64xf32>
    %62 = vector.shape_cast %61 : vector<64xf32> to vector<64x1xf32>
    %cst_22 = arith.constant 3.200000e+01 : f32
    %63 = vector.broadcast %cst_22 : f32 to vector<64x1xf32>
    %64 = arith.divf %62, %63 : vector<64x1xf32>
    %65 = vector.broadcast %57 : vector<64x1xf32> to vector<64x32xf32>
    %66 = arith.subf %53, %65 : vector<64x32xf32>
    %cst_23 = arith.constant 9.99999996E-13 : f32
    %67 = vector.broadcast %cst_23 : f32 to vector<64x1xf32>
    %68 = arith.addf %64, %67 : vector<64x1xf32>
    %69 = math.rsqrt %68 : vector<64x1xf32>
    %70 = vector.broadcast %69 : vector<64x1xf32> to vector<64x32xf32>
    %71 = arith.mulf %66, %70 : vector<64x32xf32>
    %72 = vector.broadcast %7 : vector<1x32xf32> to vector<64x32xf32>
    %73 = arith.mulf %71, %72 : vector<64x32xf32>
    %74 = vector.broadcast %8 : vector<1x32xf32> to vector<64x32xf32>
    %75 = arith.addf %73, %74 : vector<64x32xf32>
    %76 = arith.truncf %75 : vector<64x32xf32> to vector<64x32xbf16>
    %c0_24 = arith.constant 0 : index
    %c0_25 = arith.constant 0 : index
    %77 = vector.load %arg3[%c0_24, %c0_25] : memref<32x128xbf16, #tpu.memory_space<vmem>>, vector<32x128xbf16>
    %cst_26 = arith.constant dense<0.000000e+00> : vector<64x128xf32>
    %78 = tpu.matmul %76, %77, %cst_26 {dimension_numbers = #tpu.dot_dimension_numbers<[1], [0], [0], [1], [0, 0, 1, 1], [], []>} : vector<64x32xbf16>, vector<32x128xbf16>, vector<64x128xf32> -> vector<64x128xf32>
    %79 = vector.broadcast %9 : vector<1x128xf32> to vector<64x128xf32>
    %80 = arith.addf %78, %79 : vector<64x128xf32>
    %81 = arith.mulf %80, %80 : vector<64x128xf32>
    %82 = arith.mulf %80, %81 : vector<64x128xf32>
    %cst_27 = arith.constant 4.471500e-02 : f32
    %83 = vector.broadcast %cst_27 : f32 to vector<64x128xf32>
    %84 = arith.mulf %83, %82 : vector<64x128xf32>
    %85 = arith.addf %80, %84 : vector<64x128xf32>
    %cst_28 = arith.constant 0.797884583 : f32
    %86 = vector.broadcast %cst_28 : f32 to vector<64x128xf32>
    %87 = arith.mulf %86, %85 : vector<64x128xf32>
    %88 = math.tanh %87 : vector<64x128xf32>
    %cst_29 = arith.constant 1.000000e+00 : f32
    %89 = vector.broadcast %cst_29 : f32 to vector<64x128xf32>
    %90 = arith.addf %89, %88 : vector<64x128xf32>
    %cst_30 = arith.constant 5.000000e-01 : f32
    %91 = vector.broadcast %cst_30 : f32 to vector<64x128xf32>
    %92 = arith.mulf %91, %90 : vector<64x128xf32>
    %93 = arith.mulf %80, %92 : vector<64x128xf32>
    %94 = arith.truncf %93 : vector<64x128xf32> to vector<64x128xbf16>
    %c0_31 = arith.constant 0 : index
    %c0_32 = arith.constant 0 : index
    %95 = vector.load %arg4[%c0_31, %c0_32] : memref<128x32xbf16, #tpu.memory_space<vmem>>, vector<128x32xbf16>
    %cst_33 = arith.constant dense<0.000000e+00> : vector<64x32xf32>
    %96 = tpu.matmul %94, %95, %cst_33 {dimension_numbers = #tpu.dot_dimension_numbers<[1], [0], [0], [1], [0, 0, 1, 1], [], []>} : vector<64x128xbf16>, vector<128x32xbf16>, vector<64x32xf32> -> vector<64x32xf32>
    %97 = vector.broadcast %10 : vector<1x32xf32> to vector<64x32xf32>
    %98 = arith.addf %96, %97 : vector<64x32xf32>
    %99 = arith.addf %75, %98 : vector<64x32xf32>
    %cst_34 = arith.constant dense<0.000000e+00> : vector<64xf32>
    %100 = vector.multi_reduction <add>, %99, %cst_34 [1] : vector<64x32xf32> to vector<64xf32>
    %101 = vector.shape_cast %100 : vector<64xf32> to vector<64x1xf32>
    %cst_35 = arith.constant 3.200000e+01 : f32
    %102 = vector.broadcast %cst_35 : f32 to vector<64x1xf32>
    %103 = arith.divf %101, %102 : vector<64x1xf32>
    %104 = vector.broadcast %103 : vector<64x1xf32> to vector<64x32xf32>
    %105 = arith.subf %99, %104 : vector<64x32xf32>
    %106 = arith.mulf %105, %105 : vector<64x32xf32>
    %cst_36 = arith.constant dense<0.000000e+00> : vector<64xf32>
    %107 = vector.multi_reduction <add>, %106, %cst_36 [1] : vector<64x32xf32> to vector<64xf32>
    %108 = vector.shape_cast %107 : vector<64xf32> to vector<64x1xf32>
    %cst_37 = arith.constant 3.200000e+01 : f32
    %109 = vector.broadcast %cst_37 : f32 to vector<64x1xf32>
    %110 = arith.divf %108, %109 : vector<64x1xf32>
    %111 = vector.broadcast %103 : vector<64x1xf32> to vector<64x32xf32>
    %112 = arith.subf %99, %111 : vector<64x32xf32>
    %cst_38 = arith.constant 9.99999996E-13 : f32
    %113 = vector.broadcast %cst_38 : f32 to vector<64x1xf32>
    %114 = arith.addf %110, %113 : vector<64x1xf32>
    %115 = math.rsqrt %114 : vector<64x1xf32>
    %116 = vector.broadcast %115 : vector<64x1xf32> to vector<64x32xf32>
    %117 = arith.mulf %112, %116 : vector<64x32xf32>
    %118 = vector.broadcast %11 : vector<1x32xf32> to vector<64x32xf32>
    %119 = arith.mulf %117, %118 : vector<64x32xf32>
    %120 = vector.broadcast %12 : vector<1x32xf32> to vector<64x32xf32>
    %121 = arith.addf %119, %120 : vector<64x32xf32>
    %c0_39 = arith.constant 0 : index
    %c0_40 = arith.constant 0 : index
    %122 = vector.load %arg6[%c0_39, %c0_40] : memref<32x128xf32, #tpu.memory_space<vmem>>, vector<32x128xf32>
    %cst_41 = arith.constant dense<0.000000e+00> : vector<64x128xf32>
    %123 = tpu.matmul %121, %122, %cst_41 {dimension_numbers = #tpu.dot_dimension_numbers<[1], [0], [0], [1], [0, 0, 1, 1], [], []>} : vector<64x32xf32>, vector<32x128xf32>, vector<64x128xf32> -> vector<64x128xf32>
    %c0_42 = arith.constant 0 : index
    %c0_43 = arith.constant 0 : index
    %124 = vector.load %arg7[%c0_42, %c0_43] : memref<64x128xf32, #tpu.memory_space<vmem>>, vector<64x128xf32>
    %125 = arith.mulf %123, %124 : vector<64x128xf32>
    %c0_44 = arith.constant 0 : index
    %c0_45 = arith.constant 0 : index
    %126 = vector.load %arg8[%c0_44, %c0_45] : memref<2x64xf32, #tpu.memory_space<vmem>>, vector<2x64xf32>
    %cst_46 = arith.constant dense<0.000000e+00> : vector<2x128xf32>
    %127 = tpu.matmul %126, %125, %cst_46 {dimension_numbers = #tpu.dot_dimension_numbers<[1], [0], [0], [1], [0, 0, 1, 1], [], []>} : vector<2x64xf32>, vector<64x128xf32>, vector<2x128xf32> -> vector<2x128xf32>
    %c0_47 = arith.constant 0 : index
    %c0_48 = arith.constant 0 : index
    %128 = vector.load %arg9[%c0_47, %c0_48] : memref<2x128xf32, #tpu.memory_space<vmem>>, vector<2x128xf32>
    tpu.vector_store %arg9[%c0_47, %c0_48], %127 {strides = array<i32>} : memref<2x128xf32, #tpu.memory_space<vmem>>, vector<2x128xf32>,
    return
  }
}

</mosaic_0001>

<bundles_post_ra>
// kernel: tpu_custom_call.1
= control target key start
LH: loop header
LB: loop body
LE: loop exit
PB: predicated region body
PF: predicated region fallthrough
CT: control target
= control target key end

     0   :  { %14 = vsyncpa [#allocation3], 0  ;;  %s3307_s0 = inlined_call_operand.vmem [shape: f32[64,32], index: 0, kind: input, shape index: {}]   ;;  %s3308_s1 = inlined_call_operand.vmem [shape: bf16[3,32,32], index: 1, kind: input, shape index: {}]   ;;  %s3309_s2 = inlined_call_operand.vmem [shape: bf16[32,32], index: 2, kind: input, shape index: {}]   ;;  %s3310_s3 = inlined_call_operand.hbm [shape: bf16[32,128], index: 3, kind: input, shape index: {}]   ;;  %s3311_s4 = inlined_call_operand.vmem [shape: bf16[128,32], index: 4, kind: input, shape index: {}]   ;;  %s3312_s5 = inlined_call_operand.vmem [shape: f32[16,128], index: 5, kind: input, shape index: {}]   ;;  %s3313_s6 = inlined_call_operand.vmem [shape: f32[32,128], index: 6, kind: input, shape index: {}]   ;;  %s3314_s7 = inlined_call_operand.vmem [shape: f32[64,128], index: 7, kind: input, shape index: {}]   ;;  %s3315_s8 = inlined_call_operand.vmem [shape: f32[2,64], index: 8, kind: input, shape index: {}]   ;;  %s3316_s9 = inlined_call_operand.hbm [shape: f32[2,128], index: 9, kind: output, shape index: {}]  }
   0x1   :  { %15 = vsyncpa [#allocation4], 0  ;;  %s2677_s30 = smov [#allocation2]   ;;  %s2629_s13 = scalar_lea.hbm %s3310_s3, 256 }
   0x2   :  { %s27_s10 = sshll.u32 %s2677_s30, 4  ;;  %p2630_p0 = scmp.ne.s32.totalorder %s3310_s3, %s2629_s13  ;;  %s28_s10 = int_to_ptr.vmem [resolvable:$true] %s27_s10 }
   0x3   :  { %p2633_p1 = scmp.lt.u32.totalorder %s2629_s13, %s3310_s3 }
   0x5   :  { %p2635_p2 = pnand %p2633_p1, %p2630_p0 }
   0x7   :  { %2638 = shalt.err (!%p2635_p2)
}
   0x8   :  { %s2639_s18 = scalar_lea.vmem %s28_s10, 256  ;;  %p2644_p4 = scmp.lt.s32.totalorder %s28_s10, %s28_s10 }
   0x9   :  { %p2640_p3 = scmp.ne.s32.totalorder %s28_s10, %s2639_s18  ;;  %p2645_p5 = scmp.lt.s32.totalorder %s2639_s18, %s2639_s18 }
   0xb   :  { %p2646_p6 = por %p2645_p5, %p2644_p4 }
   0xd   :  { %p2647_p7 = pnand %p2646_p6, %p2640_p3 }
   0xf   :  { %2650 = shalt.err (!%p2647_p7)
}
  0x10   :  { %s2678_s19 = smov 64   ;;  %s2679_s20 = smov 4  }
  0x11   :  { %33 = dma.hbm_to_vmem [thread:$0]  %s3310_s3, 256, %s28_s10, [#allocation3], %s2678_s19, %s2678_s19, %s2679_s20  }
  0x12   :  { %2673 = dma.done.wait [#allocation3], 256  }
  0x13   :  { %2674 = vsyncadd [#allocation3], 4294967040  ;;  %v2530_v0 = vld [vmem:[%s3308_s1] sm:$0xff]   ;;  %v2531_v1 = vld [vmem:[%s3308_s1 + $0x8] sm:$0xff]   ;;  %vm82_vm0 = vcmask 261120   ;;  %v2680_v18 = vmov 0.0   ;;  %v66_v19 = vlaneseq }
  0x14   :  { %2519 = vmatprep.subr.bf16.mxu1 %v2530_v0  ;;  %v2755_v2 = vld [vmem:[%s3307_s0 + $0x20] sm:$0xff]  ;;  %v2760_v3 = vld [vmem:[%s3307_s0 + $0x28] sm:$0xff]  ;;  %v2765_v4 = vld [vmem:[%s3307_s0 + $0x30] sm:$0xff]  ;;  %2280 = vmatprep.subr.bf16.mxu0 %v2530_v0  ;;  %vm2681_vm1 = vmmov 0   ;;  %vm824_vm2 = vcmask 1043456   ;;  %vm716_vm3 = vcmask 64512  }
  0x15   :  { %2521 = vmatpush3.bf16.msra.mxu1 %v2530_v0  ;;  %v58_v5 = vpack.c.bf16 %v2760_v3, %v2755_v2  ;;  %v2772_v6 = vld [vmem:[%s3307_s0 + $0x38] sm:$0xff]  ;;  %2281 = vmatpush3.bf16.msra.mxu0 %v2530_v0  ;;  %v2532_v7 = vld [vmem:[%s3308_s1 + $0x10] sm:$0xff]   ;;  %v2781_v8 = vld [vmem:[%s3307_s0] sm:$0xff]  ;;  %v2830_v20 = vshrl.u32 %v66_v19, 7  ;;  %vm2024_vm4 = vcmask 523264  }
  0x16   :  { %2520 = vmatprep.subr.bf16.mxu1 %v2531_v1  ;;  %2282 = vmatprep.subr.bf16.mxu0 %v2531_v1  ;;  %v2786_v9 = vld [vmem:[%s3307_s0 + $0x8] sm:$0xff]  ;;  %v59_v10 = vpack.c.bf16 %v2772_v6, %v2765_v4  ;;  %v2795_v12 = vld [vmem:[%s3307_s0 + $0x10] sm:$0xff]  ;;  %v2800_v13 = vld [vmem:[%s3307_s0 + $0x18] sm:$0xff] }
  0x17   :  { %2288 = vmatprep.mubr.msk.bf16.mxu1 %vm82_vm0, %v58_v5  ;;  %v56_v11 = vpack.c.bf16 %v2786_v9, %v2781_v8  ;;  %v2534_v14 = vld [vmem:[%s3308_s1 + $0x20] sm:$0xff]   ;;  %v2533_v15 = vld [vmem:[%s3308_s1 + $0x18] sm:$0xff]   ;;  %v57_v16 = vpack.c.bf16 %v2800_v13, %v2795_v12  ;;  %v2535_v17 = vld [vmem:[%s3308_s1 + $0x28] sm:$0xff]   ;;  %v167_v24 = vsub.s32 1, %v2830_v20  ;;  %v68_v32 = vsub.s32 0, %v2830_v20 }
  0x18   :  { %v2842_v30 = vld [vmem:[%s3312_s5] sm:$0xff] }
  0x19   :  { %2522 = vmatpush3.bf16.msra.mxu1 %v2531_v1  ;;  %2283 = vmatpush3.bf16.msra.mxu0 %v2531_v1  ;;  %v2847_v31 = vrot.slane %v2842_v30, %v167_v24  ;;  %v2855_v38 = vrot.slane %v2842_v30, %v68_v32 }
  0x1a   :  { %2292 = vmatprep.subr.bf16.mxu1 %v2532_v7  ;;  %2284 = vmatprep.mubr.msk.bf16.mxu0 %vm82_vm0, %v56_v11 }
  0x1b   :  { %2304 = vmatprep.subr.bf16.mxu0 %v2534_v14 }
  0x1c   :  { %2289 = vmatmul.mubr.msk.bf16.vlgmr.msra.gmra.mrb[0].mxu1 %vm82_vm0, %v59_v10  ;;  %2285 = vmatmul.mubr.msk.bf16.vlgmr.msra.gmra.mrb[0].mxu0 %vm82_vm0, %v57_v16 }
  0x1d   :  { %2293 = vmatpush3.bf16.msra.mxu1 %v2532_v7  ;;  %2296 = vmatprep.mubr.msk.bf16.mxu1 %vm82_vm0, %v56_v11 }
  0x1e   :  { %2294 = vmatprep.subr.bf16.mxu1 %v2533_v15  ;;  %2305 = vmatpush3.bf16.msra.mxu0 %v2534_v14 }
  0x1f   :  { %2308 = vmatprep.mubr.msk.bf16.mxu0 %vm82_vm0, %v56_v11  ;;  %2306 = vmatprep.subr.bf16.mxu0 %v2535_v17 }
  0x21   :  { %2295 = vmatpush3.bf16.msra.mxu1 %v2533_v15 }
  0x22   :  { %2307 = vmatpush3.bf16.msra.mxu0 %v2535_v17  ;;  %2316 = vmatprep.subr.bf16.mxu1 %v2680_v18 }
  0x23   :  { %2328 = vmatprep.subr.bf16.mxu0 %v2680_v18 }
  0x24   :  { %2297 = vmatmul.mubr.msk.bf16.vlgmr.msra.gmra.mrb[4].mxu1 %vm82_vm0, %v57_v16 }
  0x25   :  { %2300 = vmatprep.mubr.msk.bf16.mxu1 %vm82_vm0, %v58_v5  ;;  %2309 = vmatmul.mubr.msk.bf16.vlgmr.msra.gmra.mrb[4].mxu0 %vm82_vm0, %v57_v16 }
  0x26   :  { %2312 = vmatprep.mubr.msk.bf16.mxu0 %vm82_vm0, %v58_v5 }
  0x2c   :  { %2301 = vmatmul.mubr.msk.bf16.gmra.mrb[8].mxu1 %vm82_vm0, %v59_v10 }
  0x2d   :  { %2313 = vmatmul.mubr.msk.bf16.gmra.mrb[8].mxu0 %vm82_vm0, %v59_v10  ;;  %2318 = vmatprep.mubr.msk.bf16.mxu1 %vm2681_vm1, %v2680_v18 }
  0x2e   :  { %2330 = vmatprep.mubr.msk.bf16.mxu0 %vm2681_vm1, %v2680_v18 }
  0xef   :  { %v2832_v21 = vpop.f32.mrb[0].mxu1  ;;  %v2286_v22 = vpop.f32.mrb[0].mxu0 }
  0xf0   :  { %v145_v23 = vpop.f32.mrb[1].mxu1  ;;  %v129_v25 = vpop.f32.mrb[1].mxu0  ;;  %v138_v43 = vadd.f32 %v2286_v22, %v2855_v38  ;;  %v154_v11 = vadd.f32 %v2832_v21, %v2855_v38 }
  0xf1   :  { %v2835_v26 = vpop.f32.mrb[2].mxu1  ;;  %v2287_v27 = vpop.f32.mrb[2].mxu0  ;;  %v130_v46 = vadd.f32 %v129_v25, %v2855_v38  ;;  %v146_v60 = vadd.f32 %v145_v23, %v2855_v38 }
  0xf2   :  { %v2837_v28 = vpop.f32.mrb[3].mxu1  ;;  %v132_v29 = vpop.f32.mrb[3].mxu0  ;;  %v334_v48 = vpack.c.bf16 %v138_v43, %v138_v43  ;;  %v141_v14 = vadd.f32 %v2287_v27, %v2855_v38  ;;  %v338_v16 = vpack.c.bf16 %v154_v11, %v154_v11 }
  0xf3   :  { %v332_v51 = vpack.c.bf16 %v130_v46, %v130_v46  ;;  %v133_v62 = vadd.f32 %v132_v29, %v2855_v38  ;;  %v336_v0 = vpack.c.bf16 %v146_v60, %v146_v60  ;;  %v149_v21 = vadd.f32 %v2837_v28, %v2855_v38 }
  0xf4   :  { %v335_v17 = vpack.c.bf16 %v141_v14, %v141_v14  ;;  %v157_v29 = vadd.f32 %v2835_v26, %v2855_v38 }
  0xf5   :  { %v333_v5 = vpack.c.bf16 %v133_v62, %v133_v62  ;;  %v337_v25 = vpack.c.bf16 %v149_v21, %v149_v21 }
  0xf6   :  { %v339_v28 = vpack.c.bf16 %v157_v29, %v157_v29 }
  0xf7   :  { %v2298_v33 = vpop.f32.mrb[4].mxu1 }
  0xf8   :  { %v224_v34 = vadd.f32 %v2298_v33, %v2847_v31  ;;  %v215_v35 = vpop.f32.mrb[5].mxu1 }
  0xf9   :  { %v216_v36 = vadd.f32 %v215_v35, %v2847_v31  ;;  %v2299_v37 = vpop.f32.mrb[6].mxu1 }
  0xfa   :  { %v342_v39 = vpack.c.bf16 %v224_v34, %v224_v34  ;;  %v218_v40 = vpop.f32.mrb[7].mxu1  ;;  %v227_v57 = vadd.f32 %v2299_v37, %v2847_v31  ;;  %v2310_v34 = vpop.f32.mrb[4].mxu0 }
  0xfb   :  { %v340_v41 = vpack.c.bf16 %v216_v36, %v216_v36  ;;  %v219_v45 = vadd.f32 %v218_v40, %v2847_v31  ;;  %v301_v36 = vpop.f32.mrb[5].mxu0 }
  0xfc   :  { %v444_v42 = vsel %vm82_vm0, %v342_v39, 0  ;;  %v343_v63 = vpack.c.bf16 %v227_v57, %v227_v57  ;;  %v2311_v39 = vpop.f32.mrb[6].mxu0 }
  0xfd   :  { %v352_v44 = vsel %vm82_vm0, %v340_v41, 0  ;;  %2329 = vmatpush3.bf16.xpose.msra.mxu0 %v444_v42  ;;  %v341_v50 = vpack.c.bf16 %v219_v45, %v219_v45  ;;  %v304_v38 = vpop.f32.mrb[7].mxu0 }
  0xfe   :  { %2317 = vmatpush3.bf16.xpose.msra.mxu1 %v352_v44  ;;  %2340 = vmatprep.subr.bf16.mxu0 %v2680_v18  ;;  %v490_v7 = vsel %vm82_vm0, %v343_v63, 0 }
  0xff   :  { %v2302_v47 = vpop.f32.mrb[8].mxu1  ;;  %2322 = vmatprep.subr.bf16.mxu1 %v2680_v18  ;;  %v398_v58 = vsel %vm82_vm0, %v341_v50, 0 }
 0x100   :  { %v231_v49 = vpop.f32.mrb[9].mxu1  ;;  %v240_v55 = vadd.f32 %v2302_v47, %v2847_v31 }
 0x101   :  { %v232_v52 = vadd.f32 %v231_v49, %v2847_v31  ;;  %v2303_v53 = vpop.f32.mrb[10].mxu1  ;;  %v2314_v49 = vpop.f32.mrb[8].mxu0 }
 0x102   :  { %v234_v54 = vpop.f32.mrb[11].mxu1  ;;  %v346_v61 = vpack.c.bf16 %v240_v55, %v240_v55  ;;  %v243_v19 = vadd.f32 %v2303_v53, %v2847_v31 }
 0x103   :  { %v344_v56 = vpack.c.bf16 %v232_v52, %v232_v52  ;;  %v235_v10 = vadd.f32 %v234_v54, %v2847_v31  ;;  %v253_v31 = vsub.s32 2, %v2830_v20 }
 0x104   :  { %2331 = vmatmul.mubr.msk.bf16.vlgmr.msra.gmra.mrb[12].mxu0 %vm82_vm0, %v334_v48  ;;  %v628_v1 = vsel %vm82_vm0, %v346_v61, 0  ;;  %v347_v23 = vpack.c.bf16 %v243_v19, %v243_v19 }
 0x105   :  { %v536_v59 = vsel %vm82_vm0, %v344_v56, 0  ;;  %2319 = vmatmul.mubr.msk.bf16.vlgmr.msra.gmra.mrb[12].mxu1 %vm82_vm0, %v332_v51  ;;  %2342 = vmatprep.mubr.msk.bf16.mxu0 %vm2681_vm1, %v2680_v18  ;;  %v345_v15 = vpack.c.bf16 %v235_v10, %v235_v10  ;;  %v254_v33 = vrot.slane %v2842_v30, %v253_v31  ;;  %v317_v51 = vpop.f32.mrb[9].mxu0 }
 0x106   :  { %2323 = vmatpush3.bf16.xpose.msra.mxu1 %v398_v58  ;;  %2341 = vmatpush3.bf16.xpose.msra.mxu0 %v536_v59  ;;  %v674_v27 = vsel %vm82_vm0, %v347_v23, 0  ;;  %v2315_v53 = vpop.f32.mrb[10].mxu0 }
 0x107   :  { %2324 = vmatprep.mubr.msk.bf16.mxu1 %vm2681_vm1, %v2680_v18  ;;  %2334 = vmatprep.subr.bf16.mxu1 %v2680_v18  ;;  %v582_v22 = vsel %vm82_vm0, %v345_v15, 0  ;;  %v310_v35 = vadd.f32 %v2310_v34, %v254_v33  ;;  %v302_v37 = vadd.f32 %v301_v36, %v254_v33  ;;  %v313_v26 = vadd.f32 %v2311_v39, %v254_v33  ;;  %v320_v56 = vpop.f32.mrb[11].mxu0 }
 0x108   :  { %2352 = vmatprep.subr.bf16.mxu0 %v2680_v18  ;;  %v305_v42 = vadd.f32 %v304_v38, %v254_v33  ;;  %v326_v50 = vadd.f32 %v2314_v49, %v254_v33  ;;  %v318_v52 = vadd.f32 %v317_v51, %v254_v33  ;;  %v329_v55 = vadd.f32 %v2315_v53, %v254_v33 }
 0x109   :  { %v815_v40 = vpack.c.bf16 %v310_v35, %v310_v35  ;;  %v813_v41 = vpack.c.bf16 %v302_v37, %v302_v37  ;;  %v816_v44 = vpack.c.bf16 %v313_v26, %v313_v26  ;;  %v321_v58 = vadd.f32 %v320_v56, %v254_v33 }
 0x10a   :  { %v814_v46 = vpack.c.bf16 %v305_v42, %v305_v42  ;;  %v819_v54 = vpack.c.bf16 %v326_v50, %v326_v50  ;;  %v817_v57 = vpack.c.bf16 %v318_v52, %v318_v52  ;;  %v820_v60 = vpack.c.bf16 %v329_v55, %v329_v55 }
 0x10b   :  { %v2917_v43 = vsel %vm824_vm2, %v815_v40, 0  ;;  %v826_v45 = vsel %vm824_vm2, %v813_v41, 0  ;;  %v2921_v47 = vsel %vm824_vm2, %v816_v44, 0  ;;  %v818_v62 = vpack.c.bf16 %v321_v58, %v321_v58 }
 0x10c   :  { %v872_v48 = vsel %vm824_vm2, %v814_v46, 0  ;;  %v2927_v59 = vsel %vm824_vm2, %v819_v54, 0  ;;  %v2930_v61 = vsel %vm824_vm2, %v817_v57, 0  ;;  %v2933_v63 = vsel %vm824_vm2, %v820_v60, 0 }
 0x10d   :  { %2325 = vmatmul.mubr.msk.bf16.vlgmr.msra.gmra.mrb[16].mxu1 %vm82_vm0, %v333_v5  ;;  %2343 = vmatmul.mubr.msk.bf16.vlgmr.msra.gmra.mrb[16].mxu0 %vm82_vm0, %v336_v0  ;;  %v2936_v0 = vsel %vm824_vm2, %v818_v62, 0 }
 0x10e   :  { %2335 = vmatpush3.bf16.xpose.msra.mxu1 %v490_v7  ;;  %2353 = vmatpush3.bf16.xpose.msra.mxu0 %v628_v1 }
 0x10f   :  { %2336 = vmatprep.mubr.msk.bf16.mxu1 %vm2681_vm1, %v2680_v18  ;;  %2354 = vmatprep.mubr.msk.bf16.mxu0 %vm2681_vm1, %v2680_v18 }
 0x110   :  { %2346 = vmatprep.subr.bf16.mxu1 %v2680_v18  ;;  %2364 = vmatprep.subr.bf16.mxu0 %v2680_v18 }
 0x115   :  { %2337 = vmatmul.mubr.msk.bf16.vlgmr.msra.gmra.mrb[20].mxu1 %vm82_vm0, %v335_v17  ;;  %2355 = vmatmul.mubr.msk.bf16.vlgmr.msra.gmra.mrb[20].mxu0 %vm82_vm0, %v338_v16 }
 0x116   :  { %2347 = vmatpush3.bf16.xpose.msra.mxu1 %v582_v22  ;;  %2348 = vmatprep.mubr.msk.bf16.mxu1 %vm2681_vm1, %v2680_v18 }
 0x117   :  { %2358 = vmatprep.subr.bf16.mxu1 %v2680_v18  ;;  %2366 = vmatprep.mubr.msk.bf16.mxu0 %vm2681_vm1, %v2680_v18 }
 0x118   :  { %2365 = vmatpush3.bf16.msra.mxu0 %v826_v45 }
 0x119   :  { %2376 = vmatprep.subr.bf16.mxu0 %v2680_v18 }
 0x11d   :  { %2349 = vmatmul.mubr.msk.bf16.vlgmr.msra.gmra.mrb[24].mxu1 %vm82_vm0, %v337_v25 }
 0x11e   :  { %2359 = vmatpush3.bf16.xpose.msra.mxu1 %v674_v27  ;;  %2360 = vmatprep.mubr.msk.bf16.mxu1 %vm2681_vm1, %v2680_v18 }
 0x11f   :  { %2370 = vmatprep.subr.bf16.mxu1 %v2680_v18 }
 0x125   :  { %2361 = vmatmul.mubr.msk.bf16.vlgmr.msra.gmra.mrb[28].mxu1 %vm82_vm0, %v339_v28 }
 0x126   :  { %2372 = vmatprep.mubr.msk.bf16.mxu1 %vm2681_vm1, %v2680_v18  ;;  %2371 = vmatpush3.bf16.msra.mxu1 %v872_v48 }
 0x127   :  { %2382 = vmatprep.subr.bf16.mxu1 %v2680_v18 }
 0x1d7   :  { %v480_v1 = vpop.f32.mrb[12].mxu0 }
 0x1d8   :  { %v388_v5 = vpop.f32.mrb[12].mxu1  ;;  %v723_v7 = vsel %vm716_vm3, %v480_v1, -inf  ;;  %v2332_v10 = vpop.f32.mrb[13].mxu0 }
 0x1d9   :  { %724 = vmax.xlane.f32.xlu1 %v723_v7  ;;  %v717_v11 = vsel %vm716_vm3, %v388_v5, -inf  ;;  %v2320_v14 = vpop.f32.mrb[13].mxu1  ;;  %v483_v15 = vpop.f32.mrb[14].mxu0 }
 0x1da   :  { %718 = vmax.xlane.f32.xlu0 %v717_v11  ;;  %v391_v16 = vpop.f32.mrb[14].mxu1  ;;  %v2333_v17 = vpop.f32.mrb[15].mxu0 }
 0x1db   :  { %v2321_v19 = vpop.f32.mrb[15].mxu1 }
 0x1e0   :  { %v434_v22 = vpop.f32.mrb[16].mxu1  ;;  %v572_v21 = vpop.f32.mrb[16].mxu0 }
 0x1e1   :  { %v2326_v23 = vpop.f32.mrb[17].mxu1  ;;  %v2344_v25 = vpop.f32.mrb[17].mxu0  ;;  %v720_v27 = vsel %vm716_vm3, %v434_v22, -inf  ;;  %v729_v34 = vsel %vm716_vm3, %v572_v21, -inf }
 0x1e2   :  { %v575_v29 = vpop.f32.mrb[18].mxu0  ;;  %721 = vmax.xlane.f32.xlu0 %v720_v27  ;;  %v437_v28 = vpop.f32.mrb[18].mxu1 }
 0x1e3   :  { %v2327_v31 = vpop.f32.mrb[19].mxu1  ;;  %v2345_v33 = vpop.f32.mrb[19].mxu0 }
 0x1e6   :  { %730 = vmax.xlane.f32.xlu0 %v729_v34 }
 0x1e8   :  { %v526_v35 = vpop.f32.mrb[20].mxu1  ;;  %v664_v36 = vpop.f32.mrb[20].mxu0 }
 0x1e9   :  { %v2338_v37 = vpop.f32.mrb[21].mxu1  ;;  %v2356_v39 = vpop.f32.mrb[21].mxu0  ;;  %v735_v40 = vsel %vm716_vm3, %v664_v36, -inf  ;;  %v726_v26 = vsel %vm716_vm3, %v526_v35, -inf }
 0x1ea   :  { %v667_v38 = vpop.f32.mrb[22].mxu0  ;;  %736 = vmax.xlane.f32.xlu0 %v735_v40  ;;  %727 = vmax.xlane.f32.xlu1 %v726_v26  ;;  %v529_v41 = vpop.f32.mrb[22].mxu1 }
 0x1eb   :  { %v2339_v42 = vpop.f32.mrb[23].mxu1  ;;  %v2357_v44 = vpop.f32.mrb[23].mxu0 }
 0x1f0   :  { %v618_v45 = vpop.f32.mrb[24].mxu1 }
 0x1f1   :  { %v2350_v46 = vpop.f32.mrb[25].mxu1  ;;  %v732_v48 = vsel %vm716_vm3, %v618_v45, -inf }
 0x1f2   :  { %733 = vmax.xlane.f32.xlu1 %v732_v48  ;;  %v621_v49 = vpop.f32.mrb[26].mxu1 }
 0x1f3   :  { %v2351_v50 = vpop.f32.mrb[27].mxu1 }
 0x1f8   :  { %v710_v51 = vpop.f32.mrb[28].mxu1 }
 0x1f9   :  { %v2362_v52 = vpop.f32.mrb[29].mxu1  ;;  %v738_v53 = vsel %vm716_vm3, %v710_v51, -inf }
 0x1fa   :  { %739 = vmax.xlane.f32.xlu1 %v738_v53  ;;  %v713_v54 = vpop.f32.mrb[30].mxu1 }
 0x1fb   :  { %v2363_v55 = vpop.f32.mrb[31].mxu1 }
 0x266   :  { %v725_v56 = vpop.xlane.xlu1 %724 }
 0x267   :  { %v743_v57 = vsub.f32 %v480_v1, %v725_v56  ;;  %v719_v58 = vpop.xlane.xlu0 %718 }
 0x268   :  { %v741_v60 = vsub.f32 %v388_v5, %v719_v58 }
 0x269   :  { %v753_v62 = vmul.f32 1.442695, %v743_v57 }
 0x26a   :  { %v749_v7 = vmul.f32 1.442695, %v741_v60 }
 0x26c   :  { %2548 = vpow2.f32 %v749_v7 }
 0x26d   :  { %2550 = vpow2.f32 %v753_v62 }
 0x26f   :  { %v722_v10 = vpop.xlane.xlu0 %721 }
 0x270   :  { %v742_v11 = vsub.f32 %v434_v22, %v722_v10 }
 0x272   :  { %v751_v14 = vmul.f32 1.442695, %v742_v11 }
 0x273   :  { %v731_v15 = vpop.xlane.xlu0 %730 }
 0x274   :  { %2552 = vpow2.f32 %v751_v14  ;;  %v745_v16 = vsub.f32 %v572_v21, %v731_v15 }
 0x276   :  { %v2549_v17 = vpop.eup %2548  ;;  %v757_v19 = vmul.f32 1.442695, %v745_v16 }
 0x277   :  { %v737_v23 = vpop.xlane.xlu0 %736  ;;  %v728_v25 = vpop.xlane.xlu1 %727  ;;  %v765_v27 = vsel %vm716_vm3, %v2549_v17, 0.0 }
 0x278   :  { %v2551_v29 = vpop.eup %2550  ;;  %2554 = vpow2.f32 %v757_v19  ;;  %v747_v1 = vsub.f32 %v664_v36, %v737_v23  ;;  %v744_v5 = vsub.f32 %v526_v35, %v728_v25  ;;  %766 = vadd.xlane.f32.xlu0 %v765_v27 }
 0x279   :  { %v771_v33 = vsel %vm716_vm3, %v2551_v29, 0.0 }
 0x27a   :  { %v761_v28 = vmul.f32 1.442695, %v747_v1  ;;  %v755_v31 = vmul.f32 1.442695, %v744_v5 }
 0x27c   :  { %2556 = vpow2.f32 %v761_v28  ;;  %772 = vadd.xlane.f32.xlu0 %v771_v33 }
 0x27d   :  { %2558 = vpow2.f32 %v755_v31 }
 0x27e   :  { %v2553_v22 = vpop.eup %2552 }
 0x27f   :  { %v734_v21 = vpop.xlane.xlu1 %733  ;;  %v768_v34 = vsel %vm716_vm3, %v2553_v22, 0.0 }
 0x280   :  { %v746_v37 = vsub.f32 %v618_v45, %v734_v21  ;;  %769 = vadd.xlane.f32.xlu1 %v768_v34  ;;  %v2537_v21 = vld [vmem:[%s3309_s2 + $0x8] sm:$0xff]  }
 0x282   :  { %v2555_v39 = vpop.eup %2554  ;;  %v759_v40 = vmul.f32 1.442695, %v746_v37 }
 0x283   :  { %v777_v26 = vsel %vm716_vm3, %v2555_v39, 0.0 }
 0x284   :  { %2560 = vpow2.f32 %v759_v40  ;;  %778 = vadd.xlane.f32.xlu0 %v777_v26 }
 0x286   :  { %v2950_v35 = vpop.eup %2556 }
 0x287   :  { %v2559_v36 = vpop.eup %2558  ;;  %v740_v38 = vpop.xlane.xlu1 %739  ;;  %v783_v41 = vsel %vm716_vm3, %v2950_v35, 0.0 }
 0x288   :  { %v748_v42 = vsub.f32 %v710_v51, %v740_v38  ;;  %784 = vadd.xlane.f32.xlu0 %v783_v41  ;;  %v774_v44 = vsel %vm716_vm3, %v2559_v36, 0.0 }
 0x289   :  { %775 = vadd.xlane.f32.xlu1 %v774_v44 }
 0x28a   :  { %v763_v45 = vmul.f32 1.442695, %v748_v42 }
 0x28c   :  { %2562 = vpow2.f32 %v763_v45 }
 0x28e   :  { %v2561_v46 = vpop.eup %2560 }
 0x28f   :  { %v780_v48 = vsel %vm716_vm3, %v2561_v46, 0.0 }
 0x290   :  { %781 = vadd.xlane.f32.xlu1 %v780_v48 }
 0x296   :  { %v2956_v49 = vpop.eup %2562 }
 0x297   :  { %v786_v50 = vsel %vm716_vm3, %v2956_v49, 0.0 }
 0x298   :  { %787 = vadd.xlane.f32.xlu1 %v786_v50 }
 0x305   :  { %v767_v52 = vpop.xlane.xlu0 %766 }
 0x306   :  { %2564 = vrcp.f32 %v767_v52 }
 0x309   :  { %v773_v53 = vpop.xlane.xlu0 %772 }
 0x30a   :  { %2566 = vrcp.f32 %v773_v53 }
 0x30d   :  { %v770_v51 = vpop.xlane.xlu1 %769 }
 0x30e   :  { %2568 = vrcp.f32 %v770_v51 }
 0x310   :  { %v2565_v54 = vpop.eup %2564 }
 0x311   :  { %v797_v55 = vmul.f32 %v2565_v54, %v2549_v17  ;;  %v779_v56 = vpop.xlane.xlu0 %778 }
 0x312   :  { %2570 = vrcp.f32 %v779_v56 }
 0x313   :  { %v805_v57 = vpack.c.bf16 %v797_v55, %v797_v55 }
 0x314   :  { %v2567_v58 = vpop.eup %2566 }
 0x315   :  { %2367 = vmatmul.mubr.msk.bf16.vlgmr.msra.gmra.mrb[24].mxu0 %vm716_vm3, %v805_v57  ;;  %v799_v62 = vmul.f32 %v2567_v58, %v2551_v29  ;;  %v785_v7 = vpop.xlane.xlu0 %784 }
 0x316   :  { %2377 = vmatpush3.bf16.msra.mxu0 %v2917_v43  ;;  %v776_v60 = vpop.xlane.xlu1 %775  ;;  %2378 = vmatprep.mubr.msk.bf16.mxu0 %vm2681_vm1, %v2680_v18 }
 0x317   :  { %2572 = vrcp.f32 %v776_v60  ;;  %2388 = vmatprep.subr.bf16.mxu0 %v2680_v18  ;;  %v807_v15 = vpack.c.bf16 %v799_v62, %v799_v62 }
 0x318   :  { %v2569_v10 = vpop.eup %2568  ;;  %2574 = vrcp.f32 %v785_v7 }
 0x319   :  { %v798_v11 = vmul.f32 %v2569_v10, %v2553_v22  ;;  %v2536_v22 = vld [vmem:[%s3309_s2] sm:$0xff]  }
 0x31b   :  { %v806_v14 = vpack.c.bf16 %v798_v11, %v798_v11 }
 0x31c   :  { %v2571_v16 = vpop.eup %2570 }
 0x31d   :  { %2373 = vmatmul.mubr.msk.bf16.vlgmr.msra.gmra.mrb[32].mxu1 %vm716_vm3, %v806_v14  ;;  %2379 = vmatmul.mubr.msk.bf16.vlgmr.msra.gmra.mrb[28].mxu0 %vm716_vm3, %v807_v15  ;;  %v782_v43 = vpop.xlane.xlu1 %781  ;;  %v801_v17 = vmul.f32 %v2571_v16, %v2555_v39 }
 0x31e   :  { %2383 = vmatpush3.bf16.msra.mxu1 %v2921_v47  ;;  %2389 = vmatpush3.bf16.msra.mxu0 %v2930_v61  ;;  %2576 = vrcp.f32 %v782_v43 }
 0x31f   :  { %2384 = vmatprep.mubr.msk.bf16.mxu1 %vm2681_vm1, %v2680_v18  ;;  %2390 = vmatprep.mubr.msk.bf16.mxu0 %vm2681_vm1, %v2680_v18  ;;  %v809_v25 = vpack.c.bf16 %v801_v17, %v801_v17 }
 0x320   :  { %2394 = vmatprep.subr.bf16.mxu1 %v2680_v18  ;;  %2400 = vmatprep.subr.bf16.mxu0 %v2680_v18 }
 0x321   :  { %v2573_v19 = vpop.eup %2572 }
 0x322   :  { %v800_v23 = vmul.f32 %v2573_v19, %v2559_v36  ;;  %v2575_v27 = vpop.eup %2574 }
 0x323   :  { %v803_v61 = vmul.f32 %v2575_v27, %v2950_v35 }
 0x324   :  { %v808_v29 = vpack.c.bf16 %v800_v23, %v800_v23  ;;  %v1200_v23 = vsub.s32 3, %v2830_v20 }
 0x325   :  { %2391 = vmatmul.mubr.msk.bf16.vlgmr.msra.gmra.mrb[32].mxu0 %vm716_vm3, %v809_v25  ;;  %v788_v47 = vpop.xlane.xlu1 %787  ;;  %v811_v31 = vpack.c.bf16 %v803_v61, %v803_v61 }
 0x326   :  { %2385 = vmatmul.mubr.msk.bf16.vlgmr.msra.gmra.mrb[36].mxu1 %vm716_vm3, %v808_v29  ;;  %2401 = vmatpush3.bf16.msra.mxu0 %v2927_v59  ;;  %2578 = vrcp.f32 %v788_v47  ;;  %v1201_v25 = vrot.slane %v2842_v30, %v1200_v23 }
 0x327   :  { %2395 = vmatpush3.bf16.msra.mxu1 %v2936_v0  ;;  %2396 = vmatprep.mubr.msk.bf16.mxu1 %vm2681_vm1, %v2680_v18 }
 0x328   :  { %v2577_v1 = vpop.eup %2576  ;;  %2402 = vmatprep.mubr.msk.bf16.mxu0 %vm2681_vm1, %v2680_v18  ;;  %2406 = vmatprep.subr.bf16.mxu1 %v2680_v18 }
 0x329   :  { %v802_v5 = vmul.f32 %v2577_v1, %v2561_v46  ;;  %2412 = vmatprep.subr.bf16.mxu0 %v2536_v22 }
 0x32b   :  { %v810_v28 = vpack.c.bf16 %v802_v5, %v802_v5 }
 0x32d   :  { %2403 = vmatmul.mubr.msk.bf16.vlgmr.msra.gmra.mrb[36].mxu0 %vm716_vm3, %v811_v31 }
 0x32e   :  { %2397 = vmatmul.mubr.msk.bf16.vlgmr.msra.gmra.mrb[40].mxu1 %vm716_vm3, %v810_v28  ;;  %2413 = vmatpush3.bf16.msra.mxu0 %v2536_v22 }
 0x32f   :  { %2407 = vmatpush3.bf16.msra.mxu1 %v2933_v63  ;;  %2408 = vmatprep.mubr.msk.bf16.mxu1 %vm2681_vm1, %v2680_v18 }
 0x330   :  { %v2579_v59 = vpop.eup %2578  ;;  %2414 = vmatprep.subr.bf16.mxu0 %v2537_v21 }
 0x331   :  { %v804_v0 = vmul.f32 %v2579_v59, %v2956_v49 }
 0x332   :  { %2415 = vmatpush3.bf16.msra.mxu0 %v2537_v21 }
 0x333   :  { %v812_v33 = vpack.c.bf16 %v804_v0, %v804_v0 }
 0x336   :  { %2409 = vmatmul.mubr.msk.bf16.vlgmr.msra.gmra.mrb[44].mxu1 %vm716_vm3, %v812_v33 }
 0x3e8   :  { %v862_v63 = vpop.f32.mrb[24].mxu0 }
 0x3e9   :  { %v2368_v34 = vpop.f32.mrb[25].mxu0 }
 0x3ea   :  { %v865_v37 = vpop.f32.mrb[26].mxu0 }
 0x3eb   :  { %v2369_v39 = vpop.f32.mrb[27].mxu0 }
 0x3f0   :  { %v908_v40 = vpop.f32.mrb[32].mxu1  ;;  %v954_v26 = vpop.f32.mrb[28].mxu0 }
 0x3f1   :  { %v1190_v35 = vpack.c.bf16 %v908_v40, %v862_v63  ;;  %v2374_v36 = vpop.f32.mrb[33].mxu1  ;;  %v2380_v38 = vpop.f32.mrb[29].mxu0 }
 0x3f2   :  { %v911_v41 = vpop.f32.mrb[34].mxu1  ;;  %v957_v42 = vpop.f32.mrb[30].mxu0 }
 0x3f3   :  { %v2375_v44 = vpop.f32.mrb[35].mxu1  ;;  %v2381_v45 = vpop.f32.mrb[31].mxu0  ;;  %2416 = vmatprep.mubr.msk.bf16.mxu0 %vm82_vm0, %v1190_v35 }
 0x3f8   :  { %v1046_v46 = vpop.f32.mrb[32].mxu0 }
 0x3f9   :  { %v1000_v48 = vpop.f32.mrb[36].mxu1  ;;  %v2392_v49 = vpop.f32.mrb[33].mxu0 }
 0x3fa   :  { %v1191_v50 = vpack.c.bf16 %v1000_v48, %v954_v26  ;;  %v2386_v52 = vpop.f32.mrb[37].mxu1  ;;  %v1049_v53 = vpop.f32.mrb[34].mxu0 }
 0x3fb   :  { %v1003_v51 = vpop.f32.mrb[38].mxu1  ;;  %v2393_v54 = vpop.f32.mrb[35].mxu0 }
 0x3fc   :  { %v2387_v55 = vpop.f32.mrb[39].mxu1  ;;  %2417 = vmatmul.mubr.msk.bf16.vlgmr.msra.gmra.mrb[40].mxu0 %vm82_vm0, %v1191_v50 }
 0x400   :  { %v1138_v56 = vpop.f32.mrb[36].mxu0 }
 0x401   :  { %v1092_v57 = vpop.f32.mrb[40].mxu1  ;;  %v2404_v58 = vpop.f32.mrb[37].mxu0 }
 0x402   :  { %v1192_v60 = vpack.c.bf16 %v1092_v57, %v1046_v46  ;;  %v2398_v62 = vpop.f32.mrb[41].mxu1  ;;  %v1141_v7 = vpop.f32.mrb[38].mxu0 }
 0x403   :  { %v1095_v10 = vpop.f32.mrb[42].mxu1  ;;  %v2405_v11 = vpop.f32.mrb[39].mxu0 }
 0x404   :  { %v2399_v14 = vpop.f32.mrb[43].mxu1  ;;  %2420 = vmatprep.mubr.msk.bf16.mxu0 %vm82_vm0, %v1192_v60 }
 0x409   :  { %v1184_v15 = vpop.f32.mrb[44].mxu1 }
 0x40a   :  { %v1193_v16 = vpack.c.bf16 %v1184_v15, %v1138_v56  ;;  %v2410_v43 = vpop.f32.mrb[45].mxu1 }
 0x40b   :  { %v1187_v17 = vpop.f32.mrb[46].mxu1 }
 0x40c   :  { %v2411_v19 = vpop.f32.mrb[47].mxu1  ;;  %2421 = vmatmul.mubr.msk.bf16.gmra.mrb[44].mxu0 %vm82_vm0, %v1193_v16 }
 0x4cf   :  { %v2418_v27 = vpop.f32.mrb[40].mxu0 }
 0x4d0   :  { %v1260_v29 = vpop.f32.mrb[41].mxu0  ;;  %v1269_v47 = vadd.f32 %v2418_v27, %v1201_v25 }
 0x4d1   :  { %v1261_v61 = vadd.f32 %v1260_v29, %v1201_v25  ;;  %v2419_v1 = vpop.f32.mrb[42].mxu0 }
 0x4d2   :  { %v1263_v5 = vpop.f32.mrb[43].mxu0  ;;  %v1272_v28 = vadd.f32 %v2419_v1, %v1201_v25  ;;  %v1293_v22 = vadd.f32 %v1269_v47, %v2795_v12 }
 0x4d3   :  { %v1264_v31 = vadd.f32 %v1263_v5, %v1201_v25  ;;  %v1291_v59 = vadd.f32 %v1261_v61, %v2781_v8 }
 0x4d4   :  { %v1294_v63 = vadd.f32 %v1272_v28, %v2800_v13  ;;  %v1305_v34 = vsel %vm82_vm0, %v1293_v22, 0.0 }
 0x4d5   :  { %v1299_v0 = vsel %vm82_vm0, %v1291_v59, 0.0  ;;  %v1292_v33 = vadd.f32 %v1264_v31, %v2786_v9 }
 0x4d6   :  { %1300 = vadd.xlane.f32.xlu0 %v1299_v0  ;;  %v1308_v37 = vsel %vm82_vm0, %v1294_v63, 0.0 }
 0x4d7   :  { %v1302_v21 = vsel %vm82_vm0, %v1292_v33, 0.0 }
 0x4d8   :  { %1303 = vadd.xlane.f32.xlu1 %v1302_v21 }
 0x4da   :  { %1306 = vadd.xlane.f32.xlu0 %v1305_v34  ;;  %v2539_v34 = vld [vmem:[#allocation2 + $0x8] sm:$0xff]  }
 0x4dc   :  { %1309 = vadd.xlane.f32.xlu1 %v1308_v37 }
 0x4df   :  { %v2422_v39 = vpop.f32.mrb[44].mxu0 }
 0x4e0   :  { %v1276_v8 = vpop.f32.mrb[45].mxu0  ;;  %v1285_v40 = vadd.f32 %v2422_v39, %v1201_v25 }
 0x4e1   :  { %v1277_v26 = vadd.f32 %v1276_v8, %v1201_v25  ;;  %v2423_v35 = vpop.f32.mrb[46].mxu0 }
 0x4e2   :  { %v1279_v9 = vpop.f32.mrb[47].mxu0  ;;  %v1288_v36 = vadd.f32 %v2423_v35, %v1201_v25  ;;  %v1297_v42 = vadd.f32 %v1285_v40, %v2765_v4 }
 0x4e3   :  { %v1280_v12 = vadd.f32 %v1279_v9, %v1201_v25  ;;  %v1295_v38 = vadd.f32 %v1277_v26, %v2755_v2 }
 0x4e4   :  { %v1298_v45 = vadd.f32 %v1288_v36, %v2772_v6  ;;  %v1317_v46 = vsel %vm82_vm0, %v1297_v42, 0.0 }
 0x4e5   :  { %v1311_v41 = vsel %vm82_vm0, %v1295_v38, 0.0  ;;  %v1296_v13 = vadd.f32 %v1280_v12, %v2760_v3 }
 0x4e6   :  { %1312 = vadd.xlane.f32.xlu0 %v1311_v41  ;;  %v1320_v48 = vsel %vm82_vm0, %v1298_v45, 0.0 }
 0x4e7   :  { %v1314_v44 = vsel %vm82_vm0, %v1296_v13, 0.0 }
 0x4e8   :  { %1315 = vadd.xlane.f32.xlu1 %v1314_v44 }
 0x4ea   :  { %1318 = vadd.xlane.f32.xlu0 %v1317_v46 }
 0x4ec   :  { %1321 = vadd.xlane.f32.xlu1 %v1320_v48 }
 0x563   :  { %v1301_v49 = vpop.xlane.xlu0 %1300 }
 0x564   :  { %v1324_v2 = vmul.f32 0.03125, %v1301_v49 }
 0x565   :  { %v1304_v50 = vpop.xlane.xlu1 %1303 }
 0x566   :  { %v3020_v52 = vsub.f32 %v1291_v59, %v1324_v2  ;;  %v1325_v3 = vmul.f32 0.03125, %v1304_v50 }
 0x567   :  { %v1307_v53 = vpop.xlane.xlu0 %1306 }
 0x568   :  { %v3022_v4 = vsub.f32 %v1292_v33, %v1325_v3  ;;  %v1326_v51 = vmul.f32 0.03125, %v1307_v53  ;;  %v1340_v6 = vmul.f32 %v3020_v52, %v3020_v52 }
 0x569   :  { %v1310_v54 = vpop.xlane.xlu1 %1309 }
 0x56a   :  { %v3026_v55 = vsub.f32 %v1293_v22, %v1326_v51  ;;  %v1327_v56 = vmul.f32 0.03125, %v1310_v54  ;;  %v1348_v57 = vsel %vm82_vm0, %v1340_v6, 0.0  ;;  %v1341_v58 = vmul.f32 %v3022_v4, %v3022_v4 }
 0x56b   :  { %1349 = vadd.xlane.f32.xlu0 %v1348_v57 }
 0x56c   :  { %v3031_v60 = vsub.f32 %v1294_v63, %v1327_v56  ;;  %v1351_v62 = vsel %vm82_vm0, %v1341_v58, 0.0  ;;  %v1342_v7 = vmul.f32 %v3026_v55, %v3026_v55  ;;  %v2538_v63 = vld [vmem:[#allocation2] sm:$0xff]  }
 0x56d   :  { %1352 = vadd.xlane.f32.xlu1 %v1351_v62  ;;  %2424 = vmatprep.subr.bf16.mxu1 %v2538_v63 }
 0x56e   :  { %v1354_v10 = vsel %vm82_vm0, %v1342_v7, 0.0  ;;  %v1343_v11 = vmul.f32 %v3031_v60, %v3031_v60  ;;  %2425 = vmatpush3.bf16.msra.mxu1 %v2538_v63 }
 0x56f   :  { %1355 = vadd.xlane.f32.xlu0 %v1354_v10  ;;  %2426 = vmatprep.subr.bf16.mxu1 %v2539_v34 }
 0x570   :  { %v1357_v14 = vsel %vm82_vm0, %v1343_v11, 0.0 }
 0x571   :  { %1358 = vadd.xlane.f32.xlu1 %v1357_v14 }
 0x572   :  { %2427 = vmatpush3.bf16.msra.mxu1 %v2539_v34 }
 0x573   :  { %v1313_v15 = vpop.xlane.xlu0 %1312 }
 0x574   :  { %v1328_v16 = vmul.f32 0.03125, %v1313_v15 }
 0x575   :  { %v1316_v43 = vpop.xlane.xlu1 %1315 }
 0x576   :  { %v3040_v17 = vsub.f32 %v1295_v38, %v1328_v16  ;;  %v1329_v19 = vmul.f32 0.03125, %v1316_v43 }
 0x577   :  { %v1319_v23 = vpop.xlane.xlu0 %1318 }
 0x578   :  { %v3042_v25 = vsub.f32 %v1296_v13, %v1329_v19  ;;  %v1330_v27 = vmul.f32 0.03125, %v1319_v23  ;;  %v1344_v29 = vmul.f32 %v3040_v17, %v3040_v17 }
 0x579   :  { %v1322_v47 = vpop.xlane.xlu1 %1321 }
 0x57a   :  { %v3046_v61 = vsub.f32 %v1297_v42, %v1330_v27  ;;  %v1331_v1 = vmul.f32 0.03125, %v1322_v47  ;;  %v1360_v5 = vsel %vm82_vm0, %v1344_v29, 0.0  ;;  %v1345_v28 = vmul.f32 %v3042_v25, %v3042_v25 }
 0x57b   :  { %1361 = vadd.xlane.f32.xlu0 %v1360_v5  ;;  %v1406_v42 = vsub.s32 4, %v2830_v20 }
 0x57c   :  { %v3051_v31 = vsub.f32 %v1298_v45, %v1331_v1  ;;  %v1363_v59 = vsel %vm82_vm0, %v1345_v28, 0.0  ;;  %v1346_v0 = vmul.f32 %v3046_v61, %v3046_v61  ;;  %v1418_v45 = vsub.s32 5, %v2830_v20 }
 0x57d   :  { %1364 = vadd.xlane.f32.xlu1 %v1363_v59  ;;  %v1407_v44 = vrot.slane %v2842_v30, %v1406_v42  ;;  %v1438_v42 = vsub.s32 6, %v2830_v20 }
 0x57e   :  { %v1366_v33 = vsel %vm82_vm0, %v1346_v0, 0.0  ;;  %v1347_v22 = vmul.f32 %v3051_v31, %v3051_v31  ;;  %v1419_v6 = vrot.slane %v2842_v30, %v1418_v45 }
 0x57f   :  { %1367 = vadd.xlane.f32.xlu0 %v1366_v33 }
 0x580   :  { %v1369_v21 = vsel %vm82_vm0, %v1347_v22, 0.0 }
 0x581   :  { %1370 = vadd.xlane.f32.xlu1 %v1369_v21 }
 0x5f8   :  { %v1350_v37 = vpop.xlane.xlu0 %1349 }
 0x5f9   :  { %v1372_v39 = vmul.f32 0.03125, %v1350_v37 }
 0x5fa   :  { %v1353_v8 = vpop.xlane.xlu1 %1352 }
 0x5fb   :  { %v1380_v40 = vadd.f32 1e-12, %v1372_v39  ;;  %v1373_v26 = vmul.f32 0.03125, %v1353_v8 }
 0x5fc   :  { %v1356_v35 = vpop.xlane.xlu0 %1355 }
 0x5fd   :  { %2580 = vrsqrt.f32 %v1380_v40  ;;  %v1381_v9 = vadd.f32 1e-12, %v1373_v26  ;;  %v1374_v36 = vmul.f32 0.03125, %v1356_v35  ;;  %v2541_v35 = vld [vmem:[%s3311_s4 + $0x8] sm:$0xff]  }
 0x5fe   :  { %v1359_v12 = vpop.xlane.xlu1 %1358 }
 0x5ff   :  { %2582 = vrsqrt.f32 %v1381_v9  ;;  %v1382_v38 = vadd.f32 1e-12, %v1374_v36  ;;  %v1375_v41 = vmul.f32 0.03125, %v1359_v12  ;;  %v2542_v9 = vld [vmem:[%s3311_s4 + $0x10] sm:$0xff]   ;;  %v2543_v36 = vld [vmem:[%s3311_s4 + $0x18] sm:$0xff]   ;;  %v2544_v12 = vld [vmem:[%s3311_s4 + $0x20] sm:$0xff]  }
 0x601   :  { %2584 = vrsqrt.f32 %v1382_v38  ;;  %v1383_v13 = vadd.f32 1e-12, %v1375_v41  ;;  %v2545_v38 = vld [vmem:[%s3311_s4 + $0x28] sm:$0xff]   ;;  %v2546_v41 = vld [vmem:[%s3311_s4 + $0x30] sm:$0xff]  }
 0x603   :  { %2586 = vrsqrt.f32 %v1383_v13  ;;  %v2547_v13 = vld [vmem:[%s3311_s4 + $0x38] sm:$0xff]  }
 0x607   :  { %v2581_v46 = vpop.eup %2580 }
 0x608   :  { %v1396_v48 = vmul.f32 %v2581_v46, %v3020_v52  ;;  %v1362_v49 = vpop.xlane.xlu0 %1361 }
 0x609   :  { %v2583_v2 = vpop.eup %2582  ;;  %v1376_v50 = vmul.f32 0.03125, %v1362_v49 }
 0x60a   :  { %v1397_v3 = vmul.f32 %v2583_v2, %v3022_v4  ;;  %v1365_v53 = vpop.xlane.xlu1 %1364  ;;  %v1408_v51 = vmul.f32 %v1407_v44, %v1396_v48 }
 0x60b   :  { %v2585_v54 = vpop.eup %2584  ;;  %v1384_v56 = vadd.f32 1e-12, %v1376_v50  ;;  %v1377_v57 = vmul.f32 0.03125, %v1365_v53 }
 0x60c   :  { %v1398_v58 = vmul.f32 %v2585_v54, %v3026_v55  ;;  %v1368_v62 = vpop.xlane.xlu0 %1367  ;;  %v1409_v7 = vmul.f32 %v1407_v44, %v1397_v3  ;;  %v3068_v4 = vadd.f32 %v1419_v6, %v1408_v51 }
 0x60d   :  { %v2587_v10 = vpop.eup %2586  ;;  %2588 = vrsqrt.f32 %v1384_v56  ;;  %v1385_v11 = vadd.f32 1e-12, %v1377_v57  ;;  %v1378_v52 = vmul.f32 0.03125, %v1368_v62 }
 0x60e   :  { %v1410_v14 = vmul.f32 %v1407_v44, %v1398_v58  ;;  %v1399_v15 = vmul.f32 %v2587_v10, %v3031_v60  ;;  %v1371_v16 = vpop.xlane.xlu1 %1370  ;;  %v3070_v43 = vadd.f32 %v1419_v6, %v1409_v7 }
 0x60f   :  { %2590 = vrsqrt.f32 %v1385_v11  ;;  %v1386_v30 = vadd.f32 1e-12, %v1378_v52  ;;  %v1379_v19 = vmul.f32 0.03125, %v1371_v16 }
 0x610   :  { %v1411_v23 = vmul.f32 %v1407_v44, %v1399_v15  ;;  %v1428_v55 = vpack.c.bf16 %v3070_v43, %v3068_v4  ;;  %v3075_v29 = vadd.f32 %v1419_v6, %v1410_v14 }
 0x611   :  { %2592 = vrsqrt.f32 %v1386_v30  ;;  %v1387_v27 = vadd.f32 1e-12, %v1379_v19 }
 0x612   :  { %2428 = vmatprep.mubr.msk.bf16.mxu1 %vm82_vm0, %v1428_v55  ;;  %v3077_v47 = vadd.f32 %v1419_v6, %v1411_v23 }
 0x613   :  { %2594 = vrsqrt.f32 %v1387_v27 }
 0x614   :  { %v1429_v60 = vpack.c.bf16 %v3077_v47, %v3075_v29 }
 0x616   :  { %2429 = vmatmul.mubr.msk.bf16.vlgmr.msra.gmra.mrb[48].mxu1 %vm82_vm0, %v1429_v60 }
 0x617   :  { %v2589_v1 = vpop.eup %2588 }
 0x618   :  { %v1400_v5 = vmul.f32 %v2589_v1, %v3040_v17 }
 0x619   :  { %v2591_v28 = vpop.eup %2590 }
 0x61a   :  { %v1401_v59 = vmul.f32 %v2591_v28, %v3042_v25  ;;  %v1412_v0 = vmul.f32 %v1407_v44, %v1400_v5 }
 0x61b   :  { %v2593_v33 = vpop.eup %2592 }
 0x61c   :  { %v1402_v22 = vmul.f32 %v2593_v33, %v3046_v61  ;;  %v1413_v21 = vmul.f32 %v1407_v44, %v1401_v59  ;;  %v3086_v37 = vadd.f32 %v1419_v6, %v1412_v0 }
 0x61d   :  { %v2595_v63 = vpop.eup %2594 }
 0x61e   :  { %v1403_v34 = vmul.f32 %v2595_v63, %v3051_v31  ;;  %v3088_v39 = vadd.f32 %v1419_v6, %v1413_v21  ;;  %v1414_v8 = vmul.f32 %v1407_v44, %v1402_v22  ;;  %v2540_v31 = vld [vmem:[%s3311_s4] sm:$0xff]   ;;  %s2683_s4 = smov [#allocation5]  }
 0x61f   :  { %2436 = vmatprep.subr.bf16.mxu0 %v2540_v31  ;;  %s2105_s27 = sshll.u32 %s2683_s4, 4  ;;  %s2106_s27 = int_to_ptr.vmem [resolvable:$true] %s2105_s27 }
 0x620   :  { %v1430_v40 = vpack.c.bf16 %v3088_v39, %v3086_v37  ;;  %v1415_v17 = vmul.f32 %v1407_v44, %v1403_v34  ;;  %v3093_v25 = vadd.f32 %v1419_v6, %v1414_v8  ;;  %2437 = vmatpush3.bf16.msra.mxu0 %v2540_v31  ;;  %v3128_v44 = vld [vmem:[%s3312_s5] sm:$0xff]  ;;  %p2656_p9 = scmp.lt.s32.totalorder %s2106_s27, %s2106_s27 }
 0x621   :  { %2438 = vmatprep.subr.bf16.mxu0 %v2541_v35  ;;  %v1439_v45 = vrot.slane %v3128_v44, %v1438_v42 }
 0x622   :  { %2432 = vmatprep.mubr.msk.bf16.mxu1 %vm82_vm0, %v1430_v40  ;;  %v3095_v26 = vadd.f32 %v1419_v6, %v1415_v17 }
 0x624   :  { %v1431_v61 = vpack.c.bf16 %v3095_v26, %v3093_v25  ;;  %2439 = vmatpush3.bf16.msra.mxu0 %v2541_v35 }
 0x625   :  { %2440 = vmatprep.subr.bf16.mxu0 %v2542_v9 }
 0x626   :  { %2433 = vmatmul.mubr.msk.bf16.gmra.mrb[52].mxu1 %vm82_vm0, %v1431_v61 }
 0x628   :  { %2441 = vmatpush3.bf16.msra.mxu0 %v2542_v9 }
 0x629   :  { %2442 = vmatprep.subr.bf16.mxu0 %v2543_v36 }
 0x62c   :  { %2443 = vmatpush3.bf16.msra.mxu0 %v2543_v36 }
 0x62d   :  { %2444 = vmatprep.subr.bf16.mxu0 %v2544_v12 }
 0x630   :  { %2445 = vmatpush3.bf16.msra.mxu0 %v2544_v12 }
 0x631   :  { %2446 = vmatprep.subr.bf16.mxu0 %v2545_v38 }
 0x634   :  { %2447 = vmatpush3.bf16.msra.mxu0 %v2545_v38 }
 0x635   :  { %2448 = vmatprep.subr.bf16.mxu0 %v2546_v41 }
 0x638   :  { %2449 = vmatpush3.bf16.msra.mxu0 %v2546_v41 }
 0x639   :  { %2450 = vmatprep.subr.bf16.mxu0 %v2547_v13 }
 0x63c   :  { %2451 = vmatpush3.bf16.msra.mxu0 %v2547_v13 }
 0x6e9   :  { %v2430_v46 = vpop.f32.mrb[48].mxu1 }
 0x6ea   :  { %v3131_v48 = vadd.f32 %v2430_v46, %v1439_v45  ;;  %v1498_v49 = vpop.f32.mrb[49].mxu1 }
 0x6eb   :  { %v3133_v2 = vadd.f32 %v1498_v49, %v1439_v45  ;;  %v2431_v50 = vpop.f32.mrb[50].mxu1 }
 0x6ec   :  { %v1531_v3 = vmul.f32 %v3131_v48, %v3131_v48  ;;  %v3137_v53 = vadd.f32 %v2431_v50, %v1439_v45  ;;  %v1501_v51 = vpop.f32.mrb[51].mxu1 }
 0x6ed   :  { %v1529_v6 = vmul.f32 %v3133_v2, %v3133_v2  ;;  %v3141_v54 = vadd.f32 %v1501_v51, %v1439_v45 }
 0x6ee   :  { %v1539_v56 = vmul.f32 %v1531_v3, %v3131_v48  ;;  %v1532_v57 = vmul.f32 %v3137_v53, %v3137_v53 }
 0x6ef   :  { %v1537_v58 = vmul.f32 %v1529_v6, %v3133_v2  ;;  %v1530_v62 = vmul.f32 %v3141_v54, %v3141_v54 }
 0x6f0   :  { %v1547_v7 = vmul.f32 0.044715, %v1539_v56  ;;  %v1540_v10 = vmul.f32 %v1532_v57, %v3137_v53 }
 0x6f1   :  { %v1545_v11 = vmul.f32 0.044715, %v1537_v58  ;;  %v1538_v52 = vmul.f32 %v1530_v62, %v3141_v54 }
 0x6f2   :  { %v1555_v14 = vadd.f32 %v1547_v7, %v3131_v48  ;;  %v1548_v15 = vmul.f32 0.044715, %v1540_v10 }
 0x6f3   :  { %v1553_v16 = vadd.f32 %v1545_v11, %v3133_v2  ;;  %v1546_v30 = vmul.f32 0.044715, %v1538_v52 }
 0x6f4   :  { %v1563_v19 = vmul.f32 0.7978846, %v1555_v14  ;;  %v1556_v23 = vadd.f32 %v1548_v15, %v3137_v53 }
 0x6f5   :  { %v1561_v55 = vmul.f32 0.7978846, %v1553_v16  ;;  %v1554_v27 = vadd.f32 %v1546_v30, %v3141_v54 }
 0x6f6   :  { %2596 = vtanh.f32 %v1563_v19  ;;  %v1564_v60 = vmul.f32 0.7978846, %v1556_v23 }
 0x6f7   :  { %2598 = vtanh.f32 %v1561_v55  ;;  %v1562_v1 = vmul.f32 0.7978846, %v1554_v27 }
 0x6f8   :  { %2600 = vtanh.f32 %v1564_v60 }
 0x6f9   :  { %2602 = vtanh.f32 %v1562_v1  ;;  %v2434_v5 = vpop.f32.mrb[52].mxu1 }
 0x6fa   :  { %v3155_v28 = vadd.f32 %v2434_v5, %v1439_v45  ;;  %v1514_v59 = vpop.f32.mrb[53].mxu1 }
 0x6fb   :  { %v3157_v0 = vadd.f32 %v1514_v59, %v1439_v45  ;;  %v2435_v33 = vpop.f32.mrb[54].mxu1 }
 0x6fc   :  { %v1535_v22 = vmul.f32 %v3155_v28, %v3155_v28  ;;  %v1526_v21 = vadd.f32 %v2435_v33, %v1439_v45  ;;  %v1517_v63 = vpop.f32.mrb[55].mxu1 }
 0x6fd   :  { %v1533_v34 = vmul.f32 %v3157_v0, %v3157_v0  ;;  %v1518_v8 = vadd.f32 %v1517_v63, %v1439_v45 }
 0x6fe   :  { %v1543_v40 = vmul.f32 %v1535_v22, %v3155_v28  ;;  %v1536_v17 = vmul.f32 %v1526_v21, %v1526_v21 }
 0x6ff   :  { %v1541_v61 = vmul.f32 %v1533_v34, %v3157_v0  ;;  %v1534_v31 = vmul.f32 %v1518_v8, %v1518_v8 }
 0x700   :  { %v2597_v35 = vpop.eup %2596  ;;  %v1551_v9 = vmul.f32 0.044715, %v1543_v40  ;;  %v1544_v36 = vmul.f32 %v1536_v17, %v1526_v21 }
 0x701   :  { %v2599_v12 = vpop.eup %2598  ;;  %v1579_v38 = vadd.f32 1.0, %v2597_v35  ;;  %v1549_v41 = vmul.f32 0.044715, %v1541_v61  ;;  %v1542_v13 = vmul.f32 %v1534_v31, %v1518_v8 }
 0x702   :  { %v2601_v42 = vpop.eup %2600  ;;  %v1559_v46 = vadd.f32 %v1551_v9, %v3155_v28  ;;  %v1552_v49 = vmul.f32 0.044715, %v1544_v36  ;;  %v1577_v50 = vadd.f32 1.0, %v2599_v12  ;;  %v1623_v12 = vsub.s32 7, %v2830_v20 }
 0x703   :  { %v2603_v3 = vpop.eup %2602  ;;  %v1587_v45 = vmul.f32 0.5, %v1579_v38  ;;  %v1580_v51 = vadd.f32 1.0, %v2601_v42  ;;  %v1557_v6 = vadd.f32 %v1549_v41, %v3157_v0  ;;  %v1550_v56 = vmul.f32 0.044715, %v1542_v13 }
 0x704   :  { %v1567_v57 = vmul.f32 0.7978846, %v1559_v46  ;;  %v1560_v58 = vadd.f32 %v1552_v49, %v1526_v21  ;;  %v1578_v62 = vadd.f32 1.0, %v2603_v3  ;;  %v1585_v7 = vmul.f32 0.5, %v1577_v50 }
 0x705   :  { %v1588_v10 = vmul.f32 0.5, %v1580_v51  ;;  %v1565_v11 = vmul.f32 0.7978846, %v1557_v6  ;;  %v1558_v52 = vadd.f32 %v1550_v56, %v1518_v8  ;;  %v1595_v16 = vmul.f32 %v1587_v45, %v3131_v48 }
 0x706   :  { %2604 = vtanh.f32 %v1567_v57  ;;  %v1568_v14 = vmul.f32 0.7978846, %v1560_v58  ;;  %v1586_v15 = vmul.f32 0.5, %v1578_v62  ;;  %v1593_v23 = vmul.f32 %v1585_v7, %v3133_v2 }
 0x707   :  { %v1596_v30 = vmul.f32 %v1588_v10, %v3137_v53  ;;  %2606 = vtanh.f32 %v1565_v11  ;;  %v1566_v19 = vmul.f32 0.7978846, %v1558_v52  ;;  %v1624_v38 = vrot.slane %v3128_v44, %v1623_v12 }
 0x708   :  { %2608 = vtanh.f32 %v1568_v14  ;;  %v1594_v55 = vmul.f32 %v1586_v15, %v3141_v54 }
 0x709   :  { %v1602_v27 = vpack.c.bf16 %v1596_v30, %v1595_v16  ;;  %2610 = vtanh.f32 %v1566_v19 }
 0x70a   :  { %v1601_v60 = vpack.c.bf16 %v1594_v55, %v1593_v23 }
 0x70c   :  { %2452 = vmatprep.mubr.bf16.mxu0 %v1601_v60 }
 0x70d   :  { %2453 = vmatmul.mubr.bf16.vlgmr.msra.gmra.mrb[48].mxu0 %v1602_v27 }
 0x710   :  { %v2605_v1 = vpop.eup %2604 }
 0x711   :  { %v2607_v5 = vpop.eup %2606  ;;  %v1583_v59 = vadd.f32 1.0, %v2605_v1 }
 0x712   :  { %v2609_v33 = vpop.eup %2608  ;;  %v1581_v22 = vadd.f32 1.0, %v2607_v5 }
 0x713   :  { %v2611_v48 = vpop.eup %2610  ;;  %v1584_v63 = vadd.f32 1.0, %v2609_v33  ;;  %v1591_v53 = vmul.f32 0.5, %v1583_v59 }
 0x714   :  { %v1582_v34 = vadd.f32 1.0, %v2611_v48  ;;  %v1589_v40 = vmul.f32 0.5, %v1581_v22 }
 0x715   :  { %v1592_v17 = vmul.f32 0.5, %v1584_v63  ;;  %v1599_v2 = vmul.f32 %v1591_v53, %v3155_v28 }
 0x716   :  { %v1590_v61 = vmul.f32 0.5, %v1582_v34  ;;  %v1597_v31 = vmul.f32 %v1589_v40, %v3157_v0 }
 0x717   :  { %v1600_v54 = vmul.f32 %v1592_v17, %v1526_v21 }
 0x718   :  { %v1598_v35 = vmul.f32 %v1590_v61, %v1518_v8 }
 0x719   :  { %v1604_v9 = vpack.c.bf16 %v1600_v54, %v1599_v2 }
 0x71a   :  { %v1603_v36 = vpack.c.bf16 %v1598_v35, %v1597_v31 }
 0x71c   :  { %2456 = vmatprep.mubr.bf16.mxu0 %v1603_v36 }
 0x71d   :  { %2457 = vmatmul.mubr.bf16.gmra.mrb[52].mxu0 %v1604_v9 }
 0x7e0   :  { %v2454_v41 = vpop.f32.mrb[48].mxu0 }
 0x7e1   :  { %v1707_v13 = vpop.f32.mrb[49].mxu0  ;;  %v1716_v42 = vadd.f32 %v2454_v41, %v1624_v38 }
 0x7e2   :  { %v1708_v46 = vadd.f32 %v1707_v13, %v1624_v38  ;;  %v2455_v49 = vpop.f32.mrb[50].mxu0 }
 0x7e3   :  { %v1710_v50 = vpop.f32.mrb[51].mxu0  ;;  %v1719_v3 = vadd.f32 %v2455_v49, %v1624_v38  ;;  %v1740_v45 = vadd.f32 %v1716_v42, %v3075_v29 }
 0x7e4   :  { %v1711_v28 = vadd.f32 %v1710_v50, %v1624_v38  ;;  %v1738_v21 = vadd.f32 %v1708_v46, %v3068_v4 }
 0x7e5   :  { %v1741_v44 = vadd.f32 %v1719_v3, %v3077_v47  ;;  %v1752_v6 = vsel %vm82_vm0, %v1740_v45, 0.0 }
 0x7e6   :  { %v1746_v0 = vsel %vm82_vm0, %v1738_v21, 0.0  ;;  %v1739_v8 = vadd.f32 %v1711_v28, %v3070_v43 }
 0x7e7   :  { %1747 = vadd.xlane.f32.xlu0 %v1746_v0  ;;  %v1755_v56 = vsel %vm82_vm0, %v1741_v44, 0.0 }
 0x7e8   :  { %v1749_v51 = vsel %vm82_vm0, %v1739_v8, 0.0 }
 0x7e9   :  { %1750 = vadd.xlane.f32.xlu1 %v1749_v51  ;;  %v1874_v51 = vld [vmem:[%s3313_s6] sm:$0xff] }
 0x7eb   :  { %1753 = vadd.xlane.f32.xlu0 %v1752_v6 }
 0x7ed   :  { %1756 = vadd.xlane.f32.xlu1 %v1755_v56  ;;  %v1876_v56 = vld [vmem:[%s3313_s6 + $0x10] sm:$0xff] }
 0x7f0   :  { %v2458_v57 = vpop.f32.mrb[52].mxu0 }
 0x7f1   :  { %v1723_v4 = vpop.f32.mrb[53].mxu0  ;;  %v1732_v58 = vadd.f32 %v2458_v57, %v1624_v38  ;;  %v1877_v57 = vld [vmem:[%s3313_s6 + $0x18] sm:$0xff] }
 0x7f2   :  { %v1724_v62 = vadd.f32 %v1723_v4, %v1624_v38  ;;  %v2459_v7 = vpop.f32.mrb[54].mxu0  ;;  %v2503_v4 = vpack.c.bf16 %v1877_v57, %v1876_v56 }
 0x7f3   :  { %v1726_v43 = vpop.f32.mrb[55].mxu0  ;;  %v1735_v10 = vadd.f32 %v2459_v7, %v1624_v38  ;;  %v1744_v14 = vadd.f32 %v1732_v58, %v3093_v25 }
 0x7f4   :  { %v1727_v29 = vadd.f32 %v1726_v43, %v1624_v38  ;;  %v1742_v11 = vadd.f32 %v1724_v62, %v3086_v37 }
 0x7f5   :  { %v1745_v16 = vadd.f32 %v1735_v10, %v3095_v26  ;;  %v1764_v30 = vsel %vm82_vm0, %v1744_v14, 0.0 }
 0x7f6   :  { %v1758_v52 = vsel %vm82_vm0, %v1742_v11, 0.0  ;;  %v1743_v47 = vadd.f32 %v1727_v29, %v3088_v39 }
 0x7f7   :  { %1759 = vadd.xlane.f32.xlu0 %v1758_v52  ;;  %v1767_v19 = vsel %vm82_vm0, %v1745_v16, 0.0 }
 0x7f8   :  { %v1761_v15 = vsel %vm82_vm0, %v1743_v47, 0.0 }
 0x7f9   :  { %1762 = vadd.xlane.f32.xlu1 %v1761_v15 }
 0x7fb   :  { %1765 = vadd.xlane.f32.xlu0 %v1764_v30  ;;  %v61_v30 = vld [vmem:[%s3312_s5 + $0x8] sm:$0xff] }
 0x7fd   :  { %1768 = vadd.xlane.f32.xlu1 %v1767_v19  ;;  %v1853_v19 = vrot.slane %v61_v30, %v68_v32 }
 0x874   :  { %v1748_v23 = vpop.xlane.xlu0 %1747 }
 0x875   :  { %v1770_v37 = vmul.f32 0.03125, %v1748_v23 }
 0x876   :  { %v1751_v55 = vpop.xlane.xlu1 %1750 }
 0x877   :  { %v3191_v27 = vsub.f32 %v1738_v21, %v1770_v37  ;;  %v1771_v39 = vmul.f32 0.03125, %v1751_v55  ;;  %v1865_v37 = vrot.slane %v61_v30, %v167_v24 }
 0x878   :  { %v1754_v60 = vpop.xlane.xlu0 %1753 }
 0x879   :  { %v3193_v25 = vsub.f32 %v1739_v8, %v1771_v39  ;;  %v1772_v1 = vmul.f32 0.03125, %v1754_v60  ;;  %v1786_v26 = vmul.f32 %v3191_v27, %v3191_v27 }
 0x87a   :  { %v1757_v5 = vpop.xlane.xlu1 %1756 }
 0x87b   :  { %v3197_v59 = vsub.f32 %v1740_v45, %v1772_v1  ;;  %v1773_v33 = vmul.f32 0.03125, %v1757_v5  ;;  %v1794_v22 = vsel %vm82_vm0, %v1786_v26, 0.0  ;;  %v1787_v48 = vmul.f32 %v3193_v25, %v3193_v25 }
 0x87c   :  { %1795 = vadd.xlane.f32.xlu0 %v1794_v22 }
 0x87d   :  { %v3202_v63 = vsub.f32 %v1741_v44, %v1773_v33  ;;  %v1797_v53 = vsel %vm82_vm0, %v1787_v48, 0.0  ;;  %v1788_v34 = vmul.f32 %v3197_v59, %v3197_v59  ;;  %v1875_v44 = vld [vmem:[%s3313_s6 + $0x8] sm:$0xff] }
 0x87e   :  { %1798 = vadd.xlane.f32.xlu1 %v1797_v53  ;;  %v2499_v6 = vpack.c.bf16 %v1875_v44, %v1874_v51 }
 0x87f   :  { %v1800_v40 = vsel %vm82_vm0, %v1788_v34, 0.0  ;;  %v1789_v17 = vmul.f32 %v3202_v63, %v3202_v63 }
 0x880   :  { %1801 = vadd.xlane.f32.xlu0 %v1800_v40  ;;  %2500 = vmatprep.subr.bf16.mxu1 %v2499_v6 }
 0x881   :  { %v1803_v61 = vsel %vm82_vm0, %v1789_v17, 0.0  ;;  %2502 = vmatpush3.bf16.msra.mxu1 %v2499_v6 }
 0x882   :  { %1804 = vadd.xlane.f32.xlu1 %v1803_v61  ;;  %2504 = vmatprep.subr.bf16.mxu1 %v2503_v4 }
 0x884   :  { %v1760_v2 = vpop.xlane.xlu0 %1759 }
 0x885   :  { %v1774_v54 = vmul.f32 0.03125, %v1760_v2  ;;  %2506 = vmatpush3.bf16.msra.mxu1 %v2503_v4 }
 0x886   :  { %v1763_v31 = vpop.xlane.xlu1 %1762 }
 0x887   :  { %v3211_v35 = vsub.f32 %v1742_v11, %v1774_v54  ;;  %v1775_v9 = vmul.f32 0.03125, %v1763_v31 }
 0x888   :  { %v1766_v36 = vpop.xlane.xlu0 %1765 }
 0x889   :  { %v3213_v12 = vsub.f32 %v1743_v47, %v1775_v9  ;;  %v1776_v38 = vmul.f32 0.03125, %v1766_v36  ;;  %v1790_v41 = vmul.f32 %v3211_v35, %v3211_v35 }
 0x88a   :  { %v1769_v13 = vpop.xlane.xlu1 %1768 }
 0x88b   :  { %v3217_v42 = vsub.f32 %v1744_v14, %v1776_v38  ;;  %v1777_v46 = vmul.f32 0.03125, %v1769_v13  ;;  %v1806_v49 = vsel %vm82_vm0, %v1790_v41, 0.0  ;;  %v1791_v50 = vmul.f32 %v3213_v12, %v3213_v12 }
 0x88c   :  { %1807 = vadd.xlane.f32.xlu0 %v1806_v49 }
 0x88d   :  { %v3222_v3 = vsub.f32 %v1745_v16, %v1777_v46  ;;  %v1809_v28 = vsel %vm82_vm0, %v1791_v50, 0.0  ;;  %v1792_v21 = vmul.f32 %v3217_v42, %v3217_v42 }
 0x88e   :  { %1810 = vadd.xlane.f32.xlu1 %v1809_v28 }
 0x88f   :  { %v1812_v0 = vsel %vm82_vm0, %v1792_v21, 0.0  ;;  %v1793_v8 = vmul.f32 %v3222_v3, %v3222_v3 }
 0x890   :  { %1813 = vadd.xlane.f32.xlu0 %v1812_v0 }
 0x891   :  { %v1815_v45 = vsel %vm82_vm0, %v1793_v8, 0.0 }
 0x892   :  { %1816 = vadd.xlane.f32.xlu1 %v1815_v45 }
 0x909   :  { %v1796_v58 = vpop.xlane.xlu0 %1795 }
 0x90a   :  { %v1818_v62 = vmul.f32 0.03125, %v1796_v58 }
 0x90b   :  { %v1799_v7 = vpop.xlane.xlu1 %1798 }
 0x90c   :  { %v1826_v43 = vadd.f32 1e-12, %v1818_v62  ;;  %v1819_v10 = vmul.f32 0.03125, %v1799_v7 }
 0x90d   :  { %v1802_v29 = vpop.xlane.xlu0 %1801 }
 0x90e   :  { %2612 = vrsqrt.f32 %v1826_v43  ;;  %v1827_v11 = vadd.f32 1e-12, %v1819_v10  ;;  %v1820_v52 = vmul.f32 0.03125, %v1802_v29  ;;  %v2010_v43 = vld [vmem:[%s3314_s7 + $0x18] sm:$0xff] }
 0x90f   :  { %v1805_v47 = vpop.xlane.xlu1 %1804 }
 0x910   :  { %2614 = vrsqrt.f32 %v1827_v11  ;;  %v1828_v14 = vadd.f32 1e-12, %v1820_v52  ;;  %v1821_v15 = vmul.f32 0.03125, %v1805_v47 }
 0x912   :  { %2616 = vrsqrt.f32 %v1828_v14  ;;  %v1829_v16 = vadd.f32 1e-12, %v1821_v15  ;;  %v2012_v15 = vld [vmem:[%s3314_s7 + $0x28] sm:$0xff] }
 0x914   :  { %2618 = vrsqrt.f32 %v1829_v16  ;;  %v2011_v16 = vld [vmem:[%s3314_s7 + $0x20] sm:$0xff] }
 0x918   :  { %v2613_v23 = vpop.eup %2612 }
 0x919   :  { %v1808_v55 = vpop.xlane.xlu0 %1807  ;;  %v1842_v39 = vmul.f32 %v2613_v23, %v3191_v27 }
 0x91a   :  { %v2615_v60 = vpop.eup %2614  ;;  %v1822_v1 = vmul.f32 0.03125, %v1808_v55  ;;  %v2014_v55 = vld [vmem:[%s3314_s7 + $0x38] sm:$0xff] }
 0x91b   :  { %v1843_v26 = vmul.f32 %v2615_v60, %v3193_v25  ;;  %v1811_v5 = vpop.xlane.xlu1 %1810  ;;  %v1854_v33 = vmul.f32 %v1853_v19, %v1842_v39  ;;  %v2013_v39 = vld [vmem:[%s3314_s7 + $0x30] sm:$0xff] }
 0x91c   :  { %v2617_v22 = vpop.eup %2616  ;;  %v1830_v48 = vadd.f32 1e-12, %v1822_v1  ;;  %v1823_v53 = vmul.f32 0.03125, %v1811_v5 }
 0x91d   :  { %v1855_v34 = vmul.f32 %v1853_v19, %v1843_v26  ;;  %v1814_v40 = vpop.xlane.xlu0 %1813  ;;  %v1866_v17 = vadd.f32 %v1865_v37, %v1854_v33  ;;  %v1844_v32 = vmul.f32 %v2617_v22, %v3197_v59 }
 0x91e   :  { %v2619_v61 = vpop.eup %2618  ;;  %2620 = vrsqrt.f32 %v1830_v48  ;;  %v1831_v20 = vadd.f32 1e-12, %v1823_v53  ;;  %v1824_v24 = vmul.f32 0.03125, %v1814_v40  ;;  %v2023_v48 = vld [vmem:[%s3315_s8] sm:$0x3] }
 0x91f   :  { %v1867_v2 = vadd.f32 %v1865_v37, %v1855_v34  ;;  %v1817_v27 = vpop.xlane.xlu1 %1816  ;;  %2468 = vmatprep.mubr.msk.f32.mxu1 %vm82_vm0, %v1866_v17  ;;  %v1856_v54 = vmul.f32 %v1853_v19, %v1844_v32  ;;  %v1845_v25 = vmul.f32 %v2619_v61, %v3202_v63 }
 0x920   :  { %2622 = vrsqrt.f32 %v1831_v20  ;;  %v1832_v31 = vadd.f32 1e-12, %v1824_v24  ;;  %v1825_v9 = vmul.f32 0.03125, %v1817_v27 }
 0x921   :  { %2469 = vmatmul.mubr.msk.f32.vlgmr.msra.gmra.mrb[56].mxu1 %vm82_vm0, %v1867_v2  ;;  %v1868_v36 = vadd.f32 %v1865_v37, %v1856_v54  ;;  %v1857_v38 = vmul.f32 %v1853_v19, %v1845_v25 }
 0x922   :  { %2624 = vrsqrt.f32 %v1832_v31  ;;  %v1833_v59 = vadd.f32 1e-12, %v1825_v9 }
 0x923   :  { %2471 = vmatprep.mubr.msk.f32.mxu1 %vm82_vm0, %v1868_v36  ;;  %v1869_v41 = vadd.f32 %v1865_v37, %v1857_v38 }
 0x924   :  { %2626 = vrsqrt.f32 %v1833_v59 }
 0x925   :  { %2472 = vmatmul.mubr.msk.f32.gmra.mrb[58].mxu1 %vm82_vm0, %v1869_v41 }
 0x928   :  { %v2621_v13 = vpop.eup %2620 }
 0x929   :  { %v1846_v46 = vmul.f32 %v2621_v13, %v3211_v35 }
 0x92a   :  { %v2623_v49 = vpop.eup %2622 }
 0x92b   :  { %v1858_v63 = vmul.f32 %v1853_v19, %v1846_v46  ;;  %v1847_v50 = vmul.f32 %v2623_v49, %v3213_v12  ;;  %v2682_v12 = vmov 0.0|0.0  }
 0x92c   :  { %v2625_v28 = vpop.eup %2624  ;;  %2507 = vmatprep.subr.bf16.mxu1 %v2682_v12 }
 0x92d   :  { %v1870_v21 = vadd.f32 %v1865_v37, %v1858_v63  ;;  %v1859_v0 = vmul.f32 %v1853_v19, %v1847_v50  ;;  %v1848_v8 = vmul.f32 %v2625_v28, %v3217_v42  ;;  %v2008_v42 = vld [vmem:[%s3314_s7 + $0x8] sm:$0xff] }
 0x92e   :  { %v2627_v45 = vpop.eup %2626 }
 0x92f   :  { %2474 = vmatprep.mubr.msk.f32.mxu1 %vm82_vm0, %v1870_v21  ;;  %v1871_v51 = vadd.f32 %v1865_v37, %v1859_v0  ;;  %v1860_v44 = vmul.f32 %v1853_v19, %v1848_v8  ;;  %v1849_v6 = vmul.f32 %v2627_v45, %v3222_v3  ;;  %v2007_v3 = vld [vmem:[%s3314_s7] sm:$0xff] }
 0x931   :  { %2475 = vmatmul.mubr.msk.f32.gmra.mrb[60].mxu1 %vm82_vm0, %v1871_v51  ;;  %v1872_v56 = vadd.f32 %v1865_v37, %v1860_v44  ;;  %v1861_v35 = vmul.f32 %v1853_v19, %v1849_v6 }
 0x933   :  { %2477 = vmatprep.mubr.msk.f32.mxu1 %vm82_vm0, %v1872_v56  ;;  %v1873_v57 = vadd.f32 %v1865_v37, %v1861_v35 }
 0x935   :  { %2478 = vmatmul.mubr.msk.f32.gmra.mrb[62].mxu1 %vm82_vm0, %v1873_v57 }
 0x936   :  { %2496 = vmatprep.mubr.msk.f32.mxu1 %vm2681_vm1, %v2680_v18  ;;  %v2009_v18 = vld [vmem:[%s3314_s7 + $0x10] sm:$0xff]  ;;  %s2651_s7 = scalar_lea.vmem %s2106_s27, 32 }
 0x937   :  { %p2652_p8 = scmp.ne.s32.totalorder %s2106_s27, %s2651_s7  ;;  %p2657_p10 = scmp.lt.s32.totalorder %s2651_s7, %s2651_s7 }
 0x939   :  { %p2658_p11 = por %p2657_p10, %p2656_p9 }
 0x93b   :  { %p2659_p12 = pnand %p2658_p11, %p2652_p8 }
 0x9f4   :  { %v2470_v4 = vpop.f32.mrb[56].mxu1 }
 0x9f5   :  { %v2016_v58 = vmul.f32 %v2470_v4, %v2008_v42  ;;  %v1968_v62 = vpop.f32.mrb[57].mxu1 }
 0x9f6   :  { %v2015_v7 = vmul.f32 %v2007_v3, %v1968_v62 }
 0x9f8   :  { %v2508_v10 = vpack.c.bf16 %v2016_v58, %v2015_v7  ;;  %v2473_v29 = vpop.f32.mrb[58].mxu1 }
 0x9f9   :  { %v2018_v11 = vmul.f32 %v2473_v29, %v2010_v43  ;;  %v1978_v52 = vpop.f32.mrb[59].mxu1 }
 0x9fa   :  { %v2017_v47 = vmul.f32 %v2009_v18, %v1978_v52  ;;  %2509 = vmatpush3.bf16.msra.mxu1 %v2508_v10 }
 0x9fb   :  { %2510 = vmatprep.subr.bf16.mxu1 %v2682_v12 }
 0x9fc   :  { %v2511_v14 = vpack.c.bf16 %v2018_v11, %v2017_v47 }
 0x9fe   :  { %2512 = vmatpush3.bf16.msra.mxu1 %v2511_v14 }
 0x9ff   :  { %2513 = vmatprep.subr.bf16.mxu1 %v2682_v12 }
 0xa04   :  { %v2476_v30 = vpop.f32.mrb[60].mxu1 }
 0xa05   :  { %v2020_v19 = vmul.f32 %v2476_v30, %v2012_v15  ;;  %v1988_v23 = vpop.f32.mrb[61].mxu1 }
 0xa06   :  { %v2019_v37 = vmul.f32 %v2011_v16, %v1988_v23 }
 0xa08   :  { %v2514_v60 = vpack.c.bf16 %v2020_v19, %v2019_v37  ;;  %v2479_v1 = vpop.f32.mrb[62].mxu1 }
 0xa09   :  { %v2022_v26 = vmul.f32 %v2479_v1, %v2014_v55  ;;  %v1998_v5 = vpop.f32.mrb[63].mxu1 }
 0xa0a   :  { %v2021_v33 = vmul.f32 %v2013_v39, %v1998_v5  ;;  %2515 = vmatpush3.bf16.msra.mxu1 %v2514_v60 }
 0xa0b   :  { %2516 = vmatprep.subr.bf16.mxu1 %v2682_v12 }
 0xa0c   :  { %v2517_v22 = vpack.c.bf16 %v2022_v26, %v2021_v33 }
 0xa0e   :  { %2518 = vmatpush3.bf16.msra.mxu1 %v2517_v22 }
 0xa11   :  { %2497 = vmatmul.mubr.msk.f32.vlgmr.msra.gmra.mrb[64].mxu1 %vm2024_vm4, %v2023_v48 }
 0xae4   :  { %v2094_v53 = vpop.f32.mrb[64].mxu1 }
 0xae5   :  { %2098 = vst [vmem:[#allocation5] sm:$0x3] %v2094_v53  ;;  %v2498_v34 = vpop.f32.mrb[65].mxu1 }
 0xae6   :  { %2662 = shalt.err (!%p2659_p12)
}
 0xae7   :  { %s2663_s29 = scalar_lea.hbm %s3316_s9, 32 }
 0xae8   :  { %p2664_p13 = scmp.ne.s32.totalorder %s3316_s9, %s2663_s29  ;;  %p2667_p0 = scmp.lt.u32.totalorder %s2663_s29, %s3316_s9 }
 0xaea   :  { %p2669_p1 = pnand %p2667_p0, %p2664_p13 }
 0xaec   :  { %2672 = shalt.err (!%p2669_p1)
}
 0xaed   :  { %2108 = dma.vmem_to_hbm [thread:$0]  %s2106_s27, 32, %s3316_s9, [#allocation4]  }
 0xaee   :  { %2675 = dma.done.wait [#allocation4], 32  }
 0xaef   :  { %2676 = vsyncadd [#allocation4], 4294967264 }
 0xaf0   :  { %2112 = vsyncpa [#allocation3], 1 }
 0xaf1   :  { %2113 = vsyncpa [#allocation4], 1 }

</bundles_post_ra>
